<compile_context>
chip_gen: v5e
topology: v5e:2x2
jax: 0.10.0
libtpu: 0.0.40
codegen_flags: <defaults>
</compile_context>

<pallas_src>
import jax
import jax.numpy as jnp
from jax import lax
from jax.experimental import pallas as pl
from jax.experimental.pallas import tpu as pltpu


def _round_up(x, m):
    return ((x + m - 1) // m) * m


def _pair(v):
    return (v, v) if isinstance(v, int) else tuple(v)


def _make_kernel(kh, kw, wp):
    """Fused conv (tap-wise MXU matmuls) + folded-BN shift + ReLU kernel."""

    def kernel(a_ref, w_ref, shift_ref, o_ref):
        # a_ref     : (1, A_ROWS, Cin_p)   bf16 — shift-flattened padded image
        # w_ref     : (KH*KW, Cin_p, TN)   bf16 — BN-scale-folded weight taps
        # shift_ref : (1, TN)              f32  — folded BN shift
        # o_ref     : (1, MG, TN)
        mg = o_ref.shape[1]
        tn = o_ref.shape[2]
        acc = jnp.zeros((mg, tn), dtype=jnp.float32)
        for t in range(kh * kw):                       # static unroll over taps
            off = (t // kw) * wp + (t % kw)            # row shift for this tap
            a_tap = a_ref[0, off:off + mg, :]          # (MG, Cin_p) bf16 window
            acc = acc + jnp.dot(a_tap, w_ref[t],
                                preferred_element_type=jnp.float32)
        y = acc + shift_ref[...]                       # f32 epilogue
        o_ref[0] = jnp.maximum(y, 0.0).astype(o_ref.dtype)

    return kernel


def basic_conv2d(x_nchw, weight, gamma, beta, running_mean, running_var,
                 *, stride, padding, eps=1e-5, tile_n=128):
    """Forward of BasicConv2d: conv(bias=False) -> BatchNorm (eval) -> ReLU."""
    cout, cin, kh, kw = weight.shape
    n, _, h, w = x_nchw.shape
    sh, sw = _pair(stride)
    ph, pw = _pair(padding)

    hp, wp = h + 2 * ph, w + 2 * pw                    # padded spatial extent
    ho = (h + 2 * ph - kh) // sh + 1                   # final output extent
    wo = (w + 2 * pw - kw) // sw + 1

    cin_p = _round_up(cin, 8)                          # sublane-align contraction
    cout_p = _round_up(cout, tile_n)                   # lane-dense output stores

    mg = _round_up(hp * wp, 8)                         # output rows per image
    a_rows = _round_up(mg + (kh - 1) * wp + (kw - 1), 8)   # + tap-shift halo

    # ---- A operand: NHWC, zero-pad spatial + channels, flatten rows, tail-pad.
    x_nhwc = jnp.transpose(x_nchw, (0, 2, 3, 1))
    xp = jnp.pad(x_nhwc, ((0, 0), (ph, ph), (pw, pw), (0, cin_p - cin)))
    a = xp.reshape(n, hp * wp, cin_p)
    a = jnp.pad(a, ((0, 0), (0, a_rows - hp * wp), (0, 0)))
    a = a.astype(jnp.bfloat16)

    # ---- Weights: fold eval-mode BN scale in f32, pad, cast to bf16.
    inv_std = 1.0 / jnp.sqrt(running_var.astype(jnp.float32) + eps)
    scale = gamma.astype(jnp.float32) * inv_std                         # (Cout,)
    shift = beta.astype(jnp.float32) - running_mean.astype(jnp.float32) * scale
    w_hwio = jnp.transpose(weight, (2, 3, 1, 0)).astype(jnp.float32)    # (KH,KW,Cin,Cout)
    w_hwio = w_hwio * scale[None, None, None, :]
    w_hwio = jnp.pad(w_hwio,
                     ((0, 0), (0, 0), (0, cin_p - cin), (0, cout_p - cout)))
    w_mat = w_hwio.reshape(kh * kw, cin_p, cout_p).astype(jnp.bfloat16)
    shift_p = jnp.pad(shift, (0, cout_p - cout)).reshape(1, cout_p)

    kernel = _make_kernel(kh, kw, wp)
    grid = (n, cout_p // tile_n)

    out_full = pl.pallas_call(
        kernel,
        out_shape=jax.ShapeDtypeStruct((n, mg, cout_p), jnp.float32),
        grid_spec=pltpu.PrefetchScalarGridSpec(
            num_scalar_prefetch=0,
            grid=grid,
            in_specs=[
                pl.BlockSpec((1, a_rows, cin_p), lambda b, c: (b, 0, 0)),
                pl.BlockSpec((kh * kw, cin_p, tile_n), lambda b, c: (0, 0, c)),
                pl.BlockSpec((1, tile_n), lambda b, c: (0, c)),
            ],
            out_specs=pl.BlockSpec((1, mg, tile_n), lambda b, c: (b, 0, c)),
        ),
        compiler_params=pltpu.CompilerParams(
            dimension_semantics=("parallel", "parallel"),
            vmem_limit_bytes=48 * 1024 * 1024,
        ),
    )(a, w_mat, shift_p)

    # Drop padded-grid junk rows/cols, apply stride subsample, un-pad Cout.
    out_full = out_full[:, :hp * wp, :cout].reshape(n, hp, wp, cout)
    out = out_full[:, 0:sh * (ho - 1) + 1:sh, 0:sw * (wo - 1) + 1:sw, :]
    return jnp.transpose(out, (0, 3, 1, 2)).astype(x_nchw.dtype)


def _reference(x, weight, gamma, beta, mean, var, *, stride, padding, eps=1e-5):
    sh, sw = _pair(stride)
    ph, pw = _pair(padding)
    y = lax.conv_general_dilated(
        x, weight, (sh, sw), [(ph, ph), (pw, pw)],
        dimension_numbers=("NCHW", "OIHW", "NCHW"))
    inv = 1.0 / jnp.sqrt(var + eps)
    y = (y - mean[None, :, None, None]) * (gamma * inv)[None, :, None, None] \
        + beta[None, :, None, None]
    return jnp.maximum(y, 0.0)


if __name__ == "__main__":
    key = jax.random.PRNGKey(0)
    kx, kw_, kg, kb, km, kv = jax.random.split(key, 6)

    # BasicConv2d(in_channels=4, out_channels=8, kernel_size=3, stride=1, padding=1)
    N, CIN, H, W = 2, 4, 16, 16
    COUT, KH, KW = 8, 3, 3
    STRIDE, PAD = 1, 1

    x = jax.random.normal(kx, (N, CIN, H, W), dtype=jnp.float32)
    weight = jax.random.normal(kw_, (COUT, CIN, KH, KW), dtype=jnp.float32) * 0.1
    gamma = jax.random.normal(kg, (COUT,), dtype=jnp.float32) * 0.1 + 1.0
    beta = jax.random.normal(kb, (COUT,), dtype=jnp.float32) * 0.1
    running_mean = jax.random.normal(km, (COUT,), dtype=jnp.float32) * 0.1
    running_var = jnp.abs(jax.random.normal(kv, (COUT,), dtype=jnp.float32)) * 0.5 + 0.5

    out = basic_conv2d(x, weight, gamma, beta, running_mean, running_var,
                       stride=STRIDE, padding=PAD)
    out = jax.block_until_ready(out)

    ref = _reference(x, weight, gamma, beta, running_mean, running_var,
                     stride=STRIDE, padding=PAD)
    assert out.shape == ref.shape == (N, COUT, H, W)
    # bf16 MXU operands (f32 accumulation) -> relaxed tolerance vs f32 reference.
    assert jnp.allclose(out, ref, atol=2e-2, rtol=2e-2), \
        float(jnp.max(jnp.abs(out - ref)))

    print("KERNEL_OK")
</pallas_src>

<mosaic_0001>
module attributes {stable_mosaic.version = 11 : i64} {
  func.func @kernel(%arg0: i32, %arg1: i32, %arg2: memref<1x368x8xbf16, #tpu.memory_space<vmem>>, %arg3: memref<9x8x128xbf16, #tpu.memory_space<vmem>>, %arg4: memref<1x128xf32, #tpu.memory_space<vmem>>, %arg5: memref<1x328x128xf32, #tpu.memory_space<vmem>>) attributes {dimension_semantics = [#tpu.dimension_semantics<parallel>, #tpu.dimension_semantics<parallel>], iteration_bounds = array<i64: 2, 1>, scalar_prefetch = 0 : i64, scratch_operands = 0 : i64, tpu.core_type = #tpu.core_type<tc>, window_params = [{transform_indices = @transform_0, window_bounds = array<i64: 1, 368, 8>}, {transform_indices = @transform_1, window_bounds = array<i64: 9, 8, 128>}, {transform_indices = @transform_2, window_bounds = array<i64: 1, 128>}, {transform_indices = @transform_3, window_bounds = array<i64: 1, 328, 128>}]} {
    %cst = arith.constant 0.000000e+00 : f32
    %0 = vector.broadcast %cst : f32 to vector<328x128xf32>
    %c0 = arith.constant 0 : index
    %c0_0 = arith.constant 0 : index
    %c0_1 = arith.constant 0 : index
    %1 = vector.load %arg2[%c0, %c0_0, %c0_1] : memref<1x368x8xbf16, #tpu.memory_space<vmem>>, vector<1x328x8xbf16>
    %2 = vector.shape_cast %1 : vector<1x328x8xbf16> to vector<328x8xbf16>
    %c0_2 = arith.constant 0 : index
    %c0_3 = arith.constant 0 : index
    %c0_4 = arith.constant 0 : index
    %3 = vector.load %arg3[%c0_2, %c0_3, %c0_4] : memref<9x8x128xbf16, #tpu.memory_space<vmem>>, vector<1x8x128xbf16>
    %4 = vector.shape_cast %3 : vector<1x8x128xbf16> to vector<8x128xbf16>
    %cst_5 = arith.constant dense<0.000000e+00> : vector<328x128xf32>
    %5 = tpu.matmul %2, %4, %cst_5 {dimension_numbers = #tpu.dot_dimension_numbers<[1], [0], [0], [1], [0, 0, 1, 1], [], []>} : vector<328x8xbf16>, vector<8x128xbf16>, vector<328x128xf32> -> vector<328x128xf32>
    %6 = arith.addf %0, %5 : vector<328x128xf32>
    %c0_6 = arith.constant 0 : index
    %c1 = arith.constant 1 : index
    %c0_7 = arith.constant 0 : index
    %7 = vector.load %arg2[%c0_6, %c1, %c0_7] : memref<1x368x8xbf16, #tpu.memory_space<vmem>>, vector<1x328x8xbf16>
    %8 = vector.shape_cast %7 : vector<1x328x8xbf16> to vector<328x8xbf16>
    %c1_8 = arith.constant 1 : index
    %c0_9 = arith.constant 0 : index
    %c0_10 = arith.constant 0 : index
    %9 = vector.load %arg3[%c1_8, %c0_9, %c0_10] : memref<9x8x128xbf16, #tpu.memory_space<vmem>>, vector<1x8x128xbf16>
    %10 = vector.shape_cast %9 : vector<1x8x128xbf16> to vector<8x128xbf16>
    %cst_11 = arith.constant dense<0.000000e+00> : vector<328x128xf32>
    %11 = tpu.matmul %8, %10, %cst_11 {dimension_numbers = #tpu.dot_dimension_numbers<[1], [0], [0], [1], [0, 0, 1, 1], [], []>} : vector<328x8xbf16>, vector<8x128xbf16>, vector<328x128xf32> -> vector<328x128xf32>
    %12 = arith.addf %6, %11 : vector<328x128xf32>
    %c0_12 = arith.constant 0 : index
    %c2 = arith.constant 2 : index
    %c0_13 = arith.constant 0 : index
    %13 = vector.load %arg2[%c0_12, %c2, %c0_13] : memref<1x368x8xbf16, #tpu.memory_space<vmem>>, vector<1x328x8xbf16>
    %14 = vector.shape_cast %13 : vector<1x328x8xbf16> to vector<328x8xbf16>
    %c2_14 = arith.constant 2 : index
    %c0_15 = arith.constant 0 : index
    %c0_16 = arith.constant 0 : index
    %15 = vector.load %arg3[%c2_14, %c0_15, %c0_16] : memref<9x8x128xbf16, #tpu.memory_space<vmem>>, vector<1x8x128xbf16>
    %16 = vector.shape_cast %15 : vector<1x8x128xbf16> to vector<8x128xbf16>
    %cst_17 = arith.constant dense<0.000000e+00> : vector<328x128xf32>
    %17 = tpu.matmul %14, %16, %cst_17 {dimension_numbers = #tpu.dot_dimension_numbers<[1], [0], [0], [1], [0, 0, 1, 1], [], []>} : vector<328x8xbf16>, vector<8x128xbf16>, vector<328x128xf32> -> vector<328x128xf32>
    %18 = arith.addf %12, %17 : vector<328x128xf32>
    %c0_18 = arith.constant 0 : index
    %c18 = arith.constant 18 : index
    %c0_19 = arith.constant 0 : index
    %19 = vector.load %arg2[%c0_18, %c18, %c0_19] : memref<1x368x8xbf16, #tpu.memory_space<vmem>>, vector<1x328x8xbf16>
    %20 = vector.shape_cast %19 : vector<1x328x8xbf16> to vector<328x8xbf16>
    %c3 = arith.constant 3 : index
    %c0_20 = arith.constant 0 : index
    %c0_21 = arith.constant 0 : index
    %21 = vector.load %arg3[%c3, %c0_20, %c0_21] : memref<9x8x128xbf16, #tpu.memory_space<vmem>>, vector<1x8x128xbf16>
    %22 = vector.shape_cast %21 : vector<1x8x128xbf16> to vector<8x128xbf16>
    %cst_22 = arith.constant dense<0.000000e+00> : vector<328x128xf32>
    %23 = tpu.matmul %20, %22, %cst_22 {dimension_numbers = #tpu.dot_dimension_numbers<[1], [0], [0], [1], [0, 0, 1, 1], [], []>} : vector<328x8xbf16>, vector<8x128xbf16>, vector<328x128xf32> -> vector<328x128xf32>
    %24 = arith.addf %18, %23 : vector<328x128xf32>
    %c0_23 = arith.constant 0 : index
    %c19 = arith.constant 19 : index
    %c0_24 = arith.constant 0 : index
    %25 = vector.load %arg2[%c0_23, %c19, %c0_24] : memref<1x368x8xbf16, #tpu.memory_space<vmem>>, vector<1x328x8xbf16>
    %26 = vector.shape_cast %25 : vector<1x328x8xbf16> to vector<328x8xbf16>
    %c4 = arith.constant 4 : index
    %c0_25 = arith.constant 0 : index
    %c0_26 = arith.constant 0 : index
    %27 = vector.load %arg3[%c4, %c0_25, %c0_26] : memref<9x8x128xbf16, #tpu.memory_space<vmem>>, vector<1x8x128xbf16>
    %28 = vector.shape_cast %27 : vector<1x8x128xbf16> to vector<8x128xbf16>
    %cst_27 = arith.constant dense<0.000000e+00> : vector<328x128xf32>
    %29 = tpu.matmul %26, %28, %cst_27 {dimension_numbers = #tpu.dot_dimension_numbers<[1], [0], [0], [1], [0, 0, 1, 1], [], []>} : vector<328x8xbf16>, vector<8x128xbf16>, vector<328x128xf32> -> vector<328x128xf32>
    %30 = arith.addf %24, %29 : vector<328x128xf32>
    %c0_28 = arith.constant 0 : index
    %c20 = arith.constant 20 : index
    %c0_29 = arith.constant 0 : index
    %31 = vector.load %arg2[%c0_28, %c20, %c0_29] : memref<1x368x8xbf16, #tpu.memory_space<vmem>>, vector<1x328x8xbf16>
    %32 = vector.shape_cast %31 : vector<1x328x8xbf16> to vector<328x8xbf16>
    %c5 = arith.constant 5 : index
    %c0_30 = arith.constant 0 : index
    %c0_31 = arith.constant 0 : index
    %33 = vector.load %arg3[%c5, %c0_30, %c0_31] : memref<9x8x128xbf16, #tpu.memory_space<vmem>>, vector<1x8x128xbf16>
    %34 = vector.shape_cast %33 : vector<1x8x128xbf16> to vector<8x128xbf16>
    %cst_32 = arith.constant dense<0.000000e+00> : vector<328x128xf32>
    %35 = tpu.matmul %32, %34, %cst_32 {dimension_numbers = #tpu.dot_dimension_numbers<[1], [0], [0], [1], [0, 0, 1, 1], [], []>} : vector<328x8xbf16>, vector<8x128xbf16>, vector<328x128xf32> -> vector<328x128xf32>
    %36 = arith.addf %30, %35 : vector<328x128xf32>
    %c0_33 = arith.constant 0 : index
    %c36 = arith.constant 36 : index
    %c0_34 = arith.constant 0 : index
    %37 = vector.load %arg2[%c0_33, %c36, %c0_34] : memref<1x368x8xbf16, #tpu.memory_space<vmem>>, vector<1x328x8xbf16>
    %38 = vector.shape_cast %37 : vector<1x328x8xbf16> to vector<328x8xbf16>
    %c6 = arith.constant 6 : index
    %c0_35 = arith.constant 0 : index
    %c0_36 = arith.constant 0 : index
    %39 = vector.load %arg3[%c6, %c0_35, %c0_36] : memref<9x8x128xbf16, #tpu.memory_space<vmem>>, vector<1x8x128xbf16>
    %40 = vector.shape_cast %39 : vector<1x8x128xbf16> to vector<8x128xbf16>
    %cst_37 = arith.constant dense<0.000000e+00> : vector<328x128xf32>
    %41 = tpu.matmul %38, %40, %cst_37 {dimension_numbers = #tpu.dot_dimension_numbers<[1], [0], [0], [1], [0, 0, 1, 1], [], []>} : vector<328x8xbf16>, vector<8x128xbf16>, vector<328x128xf32> -> vector<328x128xf32>
    %42 = arith.addf %36, %41 : vector<328x128xf32>
    %c0_38 = arith.constant 0 : index
    %c37 = arith.constant 37 : index
    %c0_39 = arith.constant 0 : index
    %43 = vector.load %arg2[%c0_38, %c37, %c0_39] : memref<1x368x8xbf16, #tpu.memory_space<vmem>>, vector<1x328x8xbf16>
    %44 = vector.shape_cast %43 : vector<1x328x8xbf16> to vector<328x8xbf16>
    %c7 = arith.constant 7 : index
    %c0_40 = arith.constant 0 : index
    %c0_41 = arith.constant 0 : index
    %45 = vector.load %arg3[%c7, %c0_40, %c0_41] : memref<9x8x128xbf16, #tpu.memory_space<vmem>>, vector<1x8x128xbf16>
    %46 = vector.shape_cast %45 : vector<1x8x128xbf16> to vector<8x128xbf16>
    %cst_42 = arith.constant dense<0.000000e+00> : vector<328x128xf32>
    %47 = tpu.matmul %44, %46, %cst_42 {dimension_numbers = #tpu.dot_dimension_numbers<[1], [0], [0], [1], [0, 0, 1, 1], [], []>} : vector<328x8xbf16>, vector<8x128xbf16>, vector<328x128xf32> -> vector<328x128xf32>
    %48 = arith.addf %42, %47 : vector<328x128xf32>
    %c0_43 = arith.constant 0 : index
    %c38 = arith.constant 38 : index
    %c0_44 = arith.constant 0 : index
    %49 = vector.load %arg2[%c0_43, %c38, %c0_44] : memref<1x368x8xbf16, #tpu.memory_space<vmem>>, vector<1x328x8xbf16>
    %50 = vector.shape_cast %49 : vector<1x328x8xbf16> to vector<328x8xbf16>
    %c8 = arith.constant 8 : index
    %c0_45 = arith.constant 0 : index
    %c0_46 = arith.constant 0 : index
    %51 = vector.load %arg3[%c8, %c0_45, %c0_46] : memref<9x8x128xbf16, #tpu.memory_space<vmem>>, vector<1x8x128xbf16>
    %52 = vector.shape_cast %51 : vector<1x8x128xbf16> to vector<8x128xbf16>
    %cst_47 = arith.constant dense<0.000000e+00> : vector<328x128xf32>
    %53 = tpu.matmul %50, %52, %cst_47 {dimension_numbers = #tpu.dot_dimension_numbers<[1], [0], [0], [1], [0, 0, 1, 1], [], []>} : vector<328x8xbf16>, vector<8x128xbf16>, vector<328x128xf32> -> vector<328x128xf32>
    %54 = arith.addf %48, %53 : vector<328x128xf32>
    %c0_48 = arith.constant 0 : index
    %c0_49 = arith.constant 0 : index
    %55 = vector.load %arg4[%c0_48, %c0_49] : memref<1x128xf32, #tpu.memory_space<vmem>>, vector<1x128xf32>
    %56 = vector.broadcast %55 : vector<1x128xf32> to vector<328x128xf32>
    %57 = arith.addf %54, %56 : vector<328x128xf32>
    %cst_50 = arith.constant 0.000000e+00 : f32
    %58 = vector.broadcast %cst_50 : f32 to vector<328x128xf32>
    %59 = arith.maximumf %57, %58 : vector<328x128xf32>
    %c0_51 = arith.constant 0 : index
    %c0_52 = arith.constant 0 : index
    %c0_53 = arith.constant 0 : index
    %60 = vector.load %arg5[%c0_51, %c0_52, %c0_53] : memref<1x328x128xf32, #tpu.memory_space<vmem>>, vector<1x328x128xf32>
    %61 = vector.shape_cast %60 : vector<1x328x128xf32> to vector<328x128xf32>
    %62 = vector.shape_cast %59 : vector<328x128xf32> to vector<1x328x128xf32>
    tpu.vector_store %arg5[%c0_51, %c0_52, %c0_53], %62 {strides = array<i32>} : memref<1x328x128xf32, #tpu.memory_space<vmem>>, vector<1x328x128xf32>,
    return
  }
  func.func @transform_0(%arg0: i32, %arg1: i32) -> (i32, i32, i32) {
    %c0_i32 = arith.constant 0 : i32
    %c0_i32_0 = arith.constant 0 : i32
    %c0_i32_1 = arith.constant 0 : i32
    return %arg0, %c0_i32, %c0_i32_0 : i32, i32, i32
  }
  func.func @transform_1(%arg0: i32, %arg1: i32) -> (i32, i32, i32) {
    %c0_i32 = arith.constant 0 : i32
    %c0_i32_0 = arith.constant 0 : i32
    %c0_i32_1 = arith.constant 0 : i32
    return %c0_i32, %c0_i32_0, %arg1 : i32, i32, i32
  }
  func.func @transform_2(%arg0: i32, %arg1: i32) -> (i32, i32) {
    %c0_i32 = arith.constant 0 : i32
    %c0_i32_0 = arith.constant 0 : i32
    return %c0_i32, %arg1 : i32, i32
  }
  func.func @transform_3(%arg0: i32, %arg1: i32) -> (i32, i32, i32) {
    %c0_i32 = arith.constant 0 : i32
    %c0_i32_0 = arith.constant 0 : i32
    return %arg0, %c0_i32, %arg1 : i32, i32, i32
  }
}

</mosaic_0001>

<bundles_post_ra>
// kernel: tpu_custom_call.1
= control target key start
LH: loop header
LB: loop body
LE: loop exit
PB: predicated region body
PF: predicated region fallthrough
CT: control target
= control target key end

     0   :  { %8 = vsyncpa [#allocation3], 0  ;;  %s5705_s0 = inlined_call_operand.vmem [shape: bf16[2,368,8], index: 0, kind: input, shape index: {}]   ;;  %s5706_s1 = inlined_call_operand.vmem [shape: bf16[9,8,128], index: 1, kind: input, shape index: {}]   ;;  %s5707_s2 = inlined_call_operand.vmem [shape: f32[1,128], index: 2, kind: input, shape index: {}]   ;;  %s5708_s3 = inlined_call_operand.hbm [shape: f32[2,328,128], index: 3, kind: output, shape index: {}]  }
   0x1   :  { %10 = vsyncpa [#allocation3 + $0x1], 0  ;;  %s4264_s12 = smov 0   ;;  %s4266_s13 = smov 0  }
   0x2   :  { %s4268_s14 = smov 0   ;;  %s4270_s15 = smov 0  }
   0x3   :  { %s4272_s16 = smov 0   ;;  %s4274_s17 = smov 0  }
   0x4 LB: > { %s3571_s18 = sadd.s32 4294967295, %s4240_s17   ;;  %s3572_s19 = sadd.s32 4294967294, %s4240_s17   ;;  %s4240_s17 = sphi %s4274_s17, %s16_s17   ;;  %s4236_s16 = sphi %s4272_s16, %s5765_s16   ;;  %s4232_s15 = sphi %s4270_s15, %s5764_s15   ;;  %s4228_s14 = sphi %s4268_s14, %s5763_s14   ;;  %s4224_s13 = sphi %s4266_s13, %s5762_s13   ;;  %s4220_s12 = sphi %s4264_s12, %s5761_s12  }
   0x5   : > { %s28_s20 = sadd.s32 1, %s4236_s16  ;;  %s115_s21 = sadd.s32 1, %s4228_s14 }
   0x6   : > { %p30_p0 = scmp.ge.s32.totalorder %s28_s20, 2  ;;  %p125_p1 = scmp.ne.s32.totalorder %s4228_s14, %s4224_s13 }
   0x7   : > { %p126_p2 = scmp.eq.s32.totalorder %s3571_s18, 1  ;;  %p131_p3 = scmp.ne.s32.totalorder %s4224_s13, %s4220_s12 }
   0x8   : > { %s5767_s20 = smov (%p30_p0, %s28_s20), 0  ;;  %p132_p5 = scmp.eq.s32.totalorder %s3572_s19, 1 }
   0x9   : > { %p4304_p4 = por %p126_p2, %p125_p1  ;;  %s110_s23 = ssub.s32 %s4236_s16, %s5767_s20 }
   0xa   : > { %p3577_p6 = scmp.ge.s32.totalorder %s4240_s17, 1  ;;  %p113_p7 = scmp.eq.s32.totalorder %s110_s23, 0 }
   0xb   : > { %p4311_p8 = por %p132_p5, %p131_p3  ;;  %p171_p9 = scmp.lt.s32.totalorder %s4240_s17, 3 }
   0xc   : > { %s4317_s25 = scalar_select %p113_p7, %s4228_s14, %s115_s21  }
   0xd   : > { %p172_p10 = pnand %p3577_p6, %p171_p9 }
   0xf   : > { %175 = sbr.rel (%p172_p10) target bundleno = 933 (0x3a5), region = 32 }
  0x14   : > { %v3579_v0 = vld [vmem:[%s5706_s1 + $0x4] sm:$0xf]  ;;  %vm597_vm0 = vcmask 1043456   ;;  %p202_p11 = scmp.lt.s32.totalorder %s4232_s15, 1  ;;  %v3698_v2 = vld [vmem:[%s5706_s1 + $0x8] sm:$0xf] }
  0x15   : > { %v599_v1 = vsel %vm597_vm0, %v3579_v0, 0  ;;  %v256_v3 = vld [vmem:[%s5706_s1] sm:$0xf]  ;;  %v986_v4 = vsel %vm597_vm0, %v3698_v2, 0  ;;  %v3818_v6 = vld [vmem:[%s5706_s1 + $0x10] sm:$0xf] }
  0x16   : > { %4071 = vmatpush.bf16.msra.mxu1 %v599_v1  ;;  %4072 = vmatpush.bf16.msra.mxu2 %v599_v1  ;;  %s203_s5 = scalar_select %p202_p11, %s4232_s15, 1  ;;  %v759_v5 = vsel %vm597_vm0, %v256_v3, 0  ;;  %v1811_v7 = vsel %vm597_vm0, %v3818_v6, 0  ;;  %vm365_vm1 = vsmask.f32 7424  ;;  %vm533_vm2 = vcmask 64512  }
  0x17   : > { %608 = vmatpush.bf16.msra.mxu0 %v599_v1  ;;  %4073 = vmatpush.bf16.msra.mxu3 %v599_v1  ;;  %v3720_v2 = vld [vmem:[%s5706_s1 + $0xc] sm:$0xf]  ;;  %vm880_vm3 = vcmask 1046528   ;;  %vm1558_vm4 = vsmask.f32 6400  ;;  %vm1973_vm6 = vcmask 1045504  }
  0x18   : > { %s4075_s8 = smul.u32 184, %s203_s5  ;;  %vm2651_vm5 = vsmask.f32 5376  ;;  %vm3066_vm7 = vcmask 1044480   ;;  %s199_s5 = sand.u32 1, %s4224_s13  }
  0x19   : > { %s4076_s18 = smul.u32 328, %s4232_s15  ;;  %s3456_s27 = scalar_lea.sflag [#allocation3], %s199_s5 }
  0x1a   : > { %995 = vmatpush.bf16.msrb.mxu2 %v986_v4  ;;  %768 = vmatpush.bf16.msrb.mxu1 %v759_v5  ;;  %s4340_s11 = scalar_lea.vmem %s5705_s0, %s4075_s8  ;;  %s4074_s8 = smul.u32 328, %s199_s5 }
  0x1b   : > { %1820 = vmatpush.bf16.msrb.mxu0 %v1811_v7  ;;  %v4343_v8 = vld [vmem:[%s4340_s11 + $0x30] sm:$0xff]  ;;  %v4346_v9 = vld [vmem:[%s4340_s11 + $0x38] sm:$0xff]  ;;  %v4349_v10 = vld [vmem:[%s4340_s11 + $0x60] sm:$0xff]  ;;  %v1396_v7 = vsel %vm597_vm0, %v3720_v2, 0  ;;  %s3468_s23 = scalar_lea.hbm %s5708_s3, %s4076_s18  ;;  %s4182_s6 = scalar_lea.hbm %s5708_s3, 656 }
  0x1c   : > { %v4352_v11 = vld [vmem:[%s4340_s11 + $0x68] sm:$0xff]  ;;  %v4355_v12 = vld [vmem:[%s4340_s11] sm:$0xff]   ;;  %v414_v14 = vshll.u32 %v4343_v8, 16  ;;  %v418_v15 = vshrl.u32 %v4343_v8, 16  ;;  %v422_v16 = vshll.u32 %v4346_v9, 16  ;;  %v462_v17 = vshll.u32 %v4349_v10, 16  ;;  %1405 = vmatpush.bf16.msrb.mxu3 %v1396_v7 }
  0x1d   : > { %v4358_v13 = vld [vmem:[%s4340_s11 + $0x8] sm:$0xff]  ;;  %v466_v18 = vshrl.u32 %v4349_v10, 16  ;;  %v470_v19 = vshll.u32 %v4352_v11, 16  ;;  %v367_v20 = vshrl.u32 %v4355_v12, 16  ;;  %v369_v21 = vshll.u32 %v4355_v12, 16  ;;  %v4381_v35 = vld [vmem:[%s4340_s11 + $0x40] sm:$0xff] }
  0x1e   : > { %v4368_v22 = vrot.slane %v414_v14, 1  ;;  %v424_v23 = vrot.slane %v422_v16, 1  ;;  %v4370_v24 = vrot.slane %v462_v17, 1  ;;  %v374_v25 = vshll.u32 %v4358_v13, 16  ;;  %v4385_v36 = vld [vmem:[%s4340_s11 + $0x70] sm:$0xff]  ;;  %v4025_v38 = vld [vmem:[%s4340_s11 + $0x98] sm:$0xff] }
  0x1f   : > { %v472_v26 = vrot.slane %v470_v19, 1  ;;  %v371_v27 = vrot.slane %v369_v21, 1  ;;  %v4024_v37 = vld [vmem:[%s4340_s11 + $0x90] sm:$0xff]  ;;  %v426_v40 = vshrl.u32 %v4346_v9, 16  ;;  %v430_v41 = vshll.u32 %v4381_v35, 16  ;;  %v4409_v62 = vld [vmem:[%s4340_s11 + $0x48] sm:$0xff] }
  0x20   : > { %v420_v28 = vor.u32 %v418_v15, %v4368_v22  ;;  %v468_v29 = vor.u32 %v466_v18, %v4370_v24  ;;  %v376_v30 = vrot.slane %v374_v25, 1  ;;  %v4390_v39 = vld [vmem:[%s4340_s11 + $0x10] sm:$0xff]  ;;  %v510_v42 = vshll.u32 %v4024_v37, 16  ;;  %v255_v63 = vld [vmem:[%s4340_s11 + $0xa0] sm:$0xf]  ;;  %v4415_v1 = vld [vmem:[%s4340_s11 + $0x78] sm:$0xff] }
  0x21   : > { %v372_v31 = vor.u32 %v371_v27, %v367_v20  ;;  %v474_v43 = vshrl.u32 %v4352_v11, 16  ;;  %v478_v44 = vshll.u32 %v4385_v36, 16  ;;  %v514_v45 = vshrl.u32 %v4024_v37, 16  ;;  %v257_v0 = vld [vmem:[%s4340_s11 + $0xa4] sm:$0x1]  ;;  %v4423_v6 = vld [vmem:[%s4340_s11 + $0x18] sm:$0xff] }
  0x22   : > { %v425_v32 = vsel %vm365_vm1, %v420_v28, %v424_v23  ;;  %v473_v33 = vsel %vm365_vm1, %v468_v29, %v472_v26  ;;  %v518_v46 = vshll.u32 %v4025_v38, 16  ;;  %v378_v47 = vshrl.u32 %v4358_v13, 16  ;;  %s5312_s9 = scalar_lea.vmem [#allocation2], %s4074_s8  ;;  %s3471_s26 = sshll.u32 %s3468_s23, 4  ;;  %s3472_s26 = int_to_ptr.hbm [resolvable:$true] %s3471_s26 }
  0x23   : > { %3662 = vmatmul.msk.bf16.vlgmr.msra.gmra.mxu1 %vm533_vm2, %v425_v32  ;;  %3668 = vmatmul.msk.bf16.vlgmr.msra.gmra.mxu2 %vm533_vm2, %v473_v33  ;;  %v377_v34 = vsel %vm365_vm1, %v372_v31, %v376_v30  ;;  %v382_v48 = vshll.u32 %v4390_v39, 16  ;;  %v4398_v49 = vrot.slane %v510_v42, 1  ;;  %v428_v52 = vor.u32 %v426_v40, %v424_v23  ;;  %v4438_v31 = vld [vmem:[%s4340_s11 + $0x58] sm:$0xff]  ;;  %v4452_v42 = vld [vmem:[%s4340_s11 + $0x80] sm:$0xff]  ;;  %s3469_s15 = sshll.u32 %s5312_s9, 4  ;;  %s4176_s28 = sshra.s32 %s3472_s26, 4  ;;  %s3470_s15 = int_to_ptr.vmem [resolvable:$true] %s3469_s15  ;;  %s4177_s28 = int_to_ptr.hbm [resolvable:$true] %s4176_s28 }
  0x24   : > { %3656 = vmatmul.msk.bf16.vlgmr.msra.gmra.mxu0 %vm533_vm2, %v377_v34  ;;  %v520_v50 = vrot.slane %v518_v46, 1  ;;  %v432_v53 = vrot.slane %v430_v41, 1  ;;  %v476_v54 = vor.u32 %v474_v43, %v472_v26  ;;  %v480_v55 = vrot.slane %v478_v44, 1  ;;  %v4448_v41 = vld [vmem:[%s4340_s11 + $0x50] sm:$0xff]  ;;  %v4459_v46 = vld [vmem:[%s4340_s11 + $0x88] sm:$0xff]  ;;  %s4178_s29 = scalar_lea.hbm %s4177_s28, 328  ;;  %p4183_p1 = scmp.lt.s32.totalorder %s4177_s28, %s5708_s3 }
  0x25   : > { %v516_v51 = vor.u32 %v514_v45, %v4398_v49  ;;  %v380_v56 = vor.u32 %v378_v47, %v376_v30  ;;  %v384_v57 = vrot.slane %v382_v48, 1  ;;  %v4420_v3 = vunpack.c.l.b16 %v255_v63  ;;  %v4456_v45 = vld [vmem:[%s4340_s11 + $0x20] sm:$0xff]  ;;  %p4179_p12 = scmp.ne.s32.totalorder %s4177_s28, %s4178_s29  ;;  %p4184_p2 = scmp.lt.s32.totalorder %s4182_s6, %s4178_s29 }
  0x26   : > { %v433_v59 = vsel %vm365_vm1, %v428_v52, %v432_v53  ;;  %v481_v60 = vsel %vm365_vm1, %v476_v54, %v480_v55  ;;  %v343_v4 = vunpack.c.l.b16 %v257_v0  ;;  %v522_v5 = vshrl.u32 %v4025_v38, 16  ;;  %v4467_v54 = vld [vmem:[%s4340_s11 + $0x28] sm:$0xff] }
  0x27   : > { %v521_v58 = vsel %vm365_vm1, %v516_v51, %v520_v50  ;;  %v385_v61 = vsel %vm365_vm1, %v380_v56, %v384_v57  ;;  %v434_v15 = vshrl.u32 %v4381_v35, 16  ;;  %v438_v16 = vshll.u32 %v4409_v62, 16  ;;  %p4180_p13 = pnand %p4179_p12, %p4304_p4  ;;  %p4185_p3 = por %p4184_p2, %p4183_p1 }
  0x28   : > { %3674 = vmatmul.msk.bf16.vlgmr.msra.gmra.mxu3 %vm533_vm2, %v521_v58  ;;  %v4427_v14 = vpack.c.b16 %v343_v4, %v4420_v3  ;;  %v482_v17 = vshrl.u32 %v4385_v36, 16  ;;  %v486_v18 = vshll.u32 %v4415_v1, 16  ;;  %v524_v19 = vor.u32 %v522_v5, %v520_v50 }
  0x29   : > { %v386_v21 = vshrl.u32 %v4390_v39, 16  ;;  %v390_v23 = vshll.u32 %v4423_v6, 16  ;;  %v436_v26 = vor.u32 %v434_v15, %v432_v53  ;;  %v440_v27 = vrot.slane %v438_v16, 1  ;;  %p4181_p0 = pneg %p4180_p13 }
  0x2a   : > { %v526_v20 = vshll.u32 %v4427_v14, 16  ;;  %v484_v28 = vor.u32 %v482_v17, %v480_v55  ;;  %v488_v29 = vrot.slane %v486_v18, 1  ;;  %v454_v38 = vshll.u32 %v4438_v31, 16 }
  0x2b   : > { %v388_v32 = vor.u32 %v386_v21, %v384_v57  ;;  %v392_v33 = vrot.slane %v390_v23, 1  ;;  %v441_v34 = vsel %vm365_vm1, %v436_v26, %v440_v27  ;;  %v458_v44 = vshrl.u32 %v4438_v31, 16  ;;  %v1142_v26 = vld [vmem:[%s4340_s11 + $0x8] sm:$0xe]  ;;  %p4186_p5 = pnand %p4185_p3, %p4181_p0 }
  0x2c   : > { %v528_v25 = vrot.slane %v526_v20, 1  ;;  %v489_v37 = vsel %vm365_vm1, %v484_v28, %v488_v29  ;;  %v456_v43 = vrot.slane %v454_v38, 1  ;;  %v530_v47 = vshrl.u32 %v4427_v14, 16  ;;  %v4026_v28 = vld [vmem:[%s4340_s11 + $0x10] sm:$0xff] }
  0x2d   : > { %v393_v40 = vsel %vm365_vm1, %v388_v32, %v392_v33  ;;  %v442_v50 = vshrl.u32 %v4409_v62, 16  ;;  %v446_v51 = vshll.u32 %v4448_v41, 16  ;;  %v490_v52 = vshrl.u32 %v4415_v1, 16 }
  0x2e   : > { %v529_v30 = vsel %vm365_vm1, %v524_v19, %v528_v25  ;;  %v460_v48 = vor.u32 %v458_v44, %v456_v43  ;;  %v494_v53 = vshll.u32 %v4452_v42, 16  ;;  %v394_v56 = vshrl.u32 %v4423_v6, 16 }
  0x2f   : > { %v398_v57 = vshll.u32 %v4456_v45, 16  ;;  %v502_v58 = vshll.u32 %v4459_v46, 16  ;;  %v492_v63 = vor.u32 %v490_v52, %v488_v29  ;;  %v406_v2 = vshll.u32 %v4467_v54, 16  ;;  %v3862_v52 = vld [vmem:[%s5706_s1 + $0x18] sm:$0xf] }
  0x30   : > { %v4471_v55 = vsel %vm365_vm1, %v460_v48, %v4370_v24  ;;  %v496_v0 = vrot.slane %v494_v53, 1  ;;  %v396_v4 = vor.u32 %v394_v56, %v392_v33  ;;  %v506_v24 = vshrl.u32 %v4459_v46, 16  ;;  %v3840_v56 = vld [vmem:[%s5706_s1 + $0x14] sm:$0xf] }
  0x31   : > { %v400_v5 = vrot.slane %v398_v57, 1  ;;  %v504_v7 = vrot.slane %v502_v58, 1  ;;  %v408_v17 = vrot.slane %v406_v2, 1  ;;  %v410_v19 = vshrl.u32 %v4467_v54, 16  ;;  %v4027_v57 = vld [vmem:[%s4340_s11 + $0x18] sm:$0xff] }
  0x32   : > { %v497_v16 = vsel %vm365_vm1, %v492_v63, %v496_v0  ;;  %v1228_v29 = vunpack.c.l.b16 %v1142_v26  ;;  %v1292_v32 = vrot.slane %v4026_v28, 1  ;;  %v450_v33 = vshrl.u32 %v4448_v41, 16  ;;  %v4068_v2 = vld [vmem:[%s4340_s11] sm:$0xf0] }
  0x33   : > { %3663 = vmatmul.msk.bf16.gmra.mxu1 %vm533_vm2, %v433_v59  ;;  %3669 = vmatmul.msk.bf16.gmra.mxu2 %vm533_vm2, %v481_v60  ;;  %v532_v59 = vor.u32 %v530_v47, %v528_v25  ;;  %v444_v60 = vor.u32 %v442_v50, %v440_v27  ;;  %v508_v18 = vor.u32 %v506_v24, %v504_v7  ;;  %v4492_v27 = vld [vmem:[%s4340_s11 + $0xc] sm:$0xf]  ;;  %v2489_v53 = vsel %vm597_vm0, %v3862_v52, 0 }
  0x34   : > { %3657 = vmatmul.msk.bf16.gmra.mxu0 %vm533_vm2, %v385_v61  ;;  %v448_v61 = vrot.slane %v446_v51, 1  ;;  %v401_v20 = vsel %vm365_vm1, %v396_v4, %v400_v5  ;;  %v412_v23 = vor.u32 %v410_v19, %v408_v17  ;;  %2498 = vmatpush.bf16.msra.mxu2 %v2489_v53  ;;  %v1294_v63 = vrot.slane %v4027_v57, 1  ;;  %v4028_v4 = vld [vmem:[%s4340_s11 + $0x20] sm:$0xff]  ;;  %v4030_v53 = vld [vmem:[%s4340_s11 + $0x30] sm:$0xff] }
  0x35   : > { %v513_v21 = vsel %vm365_vm1, %v508_v18, %v4398_v49  ;;  %v1589_v52 = vshll.u32 %v4028_v4, 16 }
  0x36   : > { %v449_v15 = vsel %vm365_vm1, %v444_v60, %v448_v61  ;;  %v417_v25 = vsel %vm365_vm1, %v412_v23, %v4368_v22  ;;  %v3982_v60 = vld [vmem:[%s5706_s1 + $0x20] sm:$0xf] }
  0x38   : > { %3675 = vmatmul.msk.bf16.gmra.mxu3 %vm533_vm2, %v529_v30  ;;  %v5709_v30 = vunpack.c.l.b16 %v4492_v27 }
  0x3a   : > { %v1270_v49 = vpack.c.b16 %v5709_v30, %v1228_v29 }
  0x3c   : > { %v1291_v38 = vrot.slane %v1270_v49, 1  ;;  %v1563_v24 = vshll.u32 %v1270_v49, 16 }
  0x3e   : > { %v1293_v22 = vsel %vm880_vm3, %v1291_v38, %v1292_v32 }
  0x43   : > { %3664 = vmatmul.msk.bf16.gmra.mxu1 %vm533_vm2, %v441_v34  ;;  %3670 = vmatmul.msk.bf16.gmra.mxu2 %vm533_vm2, %v489_v37  ;;  %v498_v34 = vshrl.u32 %v4452_v42, 16  ;;  %v402_v37 = vshrl.u32 %v4456_v45, 16 }
  0x44   : > { %3658 = vmatmul.msk.bf16.gmra.mxu0 %vm533_vm2, %v393_v40  ;;  %v452_v40 = vor.u32 %v450_v33, %v448_v61  ;;  %v3172_v61 = vsel %vm597_vm0, %v3982_v60, 0  ;;  %v1577_v33 = vshrl.u32 %v4027_v57, 16 }
  0x45   : > { %v500_v44 = vor.u32 %v498_v34, %v496_v0  ;;  %v404_v47 = vor.u32 %v402_v37, %v400_v5  ;;  %3181 = vmatpush.bf16.msra.mxu0 %v3172_v61  ;;  %v1295_v0 = vsel %vm880_vm3, %v1292_v32, %v1294_v63  ;;  %v4069_v5 = vld [vmem:[%s4340_s11] sm:$0xe]  ;;  %v1580_v34 = vshll.u32 %v4027_v57, 16  ;;  %v4029_v37 = vld [vmem:[%s4340_s11 + $0x28] sm:$0xff] }
  0x46   : > { %v457_v48 = vsel %vm365_vm1, %v452_v40, %v456_v43  ;;  %v3960_v43 = vld [vmem:[%s5706_s1 + $0x1c] sm:$0xf]  ;;  %v4070_v18 = vor.u32 %v4069_v5, %v4068_v2  ;;  %v1579_v38 = vrot.slane %v1577_v33, 1  ;;  %v1298_v40 = vrot.slane %v4029_v37, 1 }
  0x47   : > { %v505_v50 = vsel %vm365_vm1, %v500_v44, %v504_v7  ;;  %v409_v51 = vsel %vm365_vm1, %v404_v47, %v408_v17  ;;  %v2904_v58 = vsel %vm597_vm0, %v3960_v43, 0  ;;  %v1560_v7 = vshrl.u32 %v1270_v49, 16 }
  0x48   : > { %3676 = vmatmul.msk.bf16.gmra.mxu3 %vm533_vm2, %v532_v59  ;;  %v2079_v59 = vsel %vm597_vm0, %v3840_v56, 0  ;;  %v1296_v17 = vrot.slane %v4028_v4, 1  ;;  %v881_v29 = vrot.slane %v4070_v18, 1  ;;  %v884_v44 = vrot.slane %v4390_v39, 1 }
  0x49   : > { %2913 = vmatpush.bf16.msra.mxu3 %v2904_v58  ;;  %2088 = vmatpush.bf16.msra.mxu1 %v2079_v59  ;;  %v1562_v19 = vrot.slane %v1560_v7, 1  ;;  %v1591_v56 = vrot.slane %v1589_v52, 2  ;;  %v1300_v57 = vrot.slane %v4030_v53, 1  ;;  %v886_v58 = vrot.slane %v4423_v6, 1 }
  0x4a   : > { %v1299_v47 = vsel %vm880_vm3, %v1296_v17, %v1298_v40  ;;  %v1595_v2 = vshrl.u32 %v4029_v37, 16 }
  0x4b   : > { %v1301_v59 = vsel %vm880_vm3, %v1298_v40, %v1300_v57 }
  0x53   : > { %3665 = vmatmul.msk.bf16.gmra.mxu1 %vm533_vm2, %v449_v15  ;;  %3671 = vmatmul.msk.bf16.gmra.mxu2 %vm533_vm2, %v497_v16  ;;  %v1568_v15 = vshrl.u32 %v4026_v28, 16  ;;  %v1571_v16 = vshll.u32 %v4026_v28, 16 }
  0x54   : > { %3659 = vmatmul.msk.bf16.gmra.mxu0 %vm533_vm2, %v401_v20  ;;  %v1565_v20 = vrot.slane %v1563_v24, 2  ;;  %v4031_v24 = vld [vmem:[%s4340_s11 + $0x38] sm:$0xff] }
  0x55   : > { %v1570_v23 = vrot.slane %v1568_v15, 1  ;;  %v1573_v26 = vrot.slane %v1571_v16, 2  ;;  %v1597_v16 = vrot.slane %v1595_v2, 1  ;;  %v1302_v18 = vrot.slane %v4031_v24, 1 }
  0x57   : > { %v1574_v32 = vor.u32 %v1573_v26, %v1570_v23 }
  0x58   : > { %3797 = vmatmul.msk.bf16.vlgmr.msrb.gmra.mxu3 %vm533_vm2, %v1293_v22  ;;  %v1582_v22 = vrot.slane %v1580_v34, 2  ;;  %v4032_v34 = vld [vmem:[%s4340_s11 + $0x40] sm:$0xff] }
  0x63   : > { %3666 = vmatmul.msk.bf16.gmra.mxu1 %vm533_vm2, %v457_v48  ;;  %3672 = vmatmul.msk.bf16.gmra.mxu2 %vm533_vm2, %v505_v50  ;;  %v1583_v48 = vor.u32 %v1582_v22, %v1579_v38 }
  0x64   : > { %3660 = vmatmul.msk.bf16.gmra.mxu0 %vm533_vm2, %v409_v51  ;;  %v1586_v51 = vshrl.u32 %v4028_v4, 16  ;;  %v1598_v4 = vshll.u32 %v4029_v37, 16 }
  0x65   : > { %v1584_v50 = vsel %vm1558_vm4, %v1574_v32, %v1583_v48 }
  0x66   : > { %v1588_v43 = vrot.slane %v1586_v51, 1 }
  0x68   : > { %3798 = vmatmul.msk.bf16.gmra.mxu3 %vm533_vm2, %v1295_v0  ;;  %v1592_v60 = vor.u32 %v1591_v56, %v1588_v43  ;;  %v1613_v56 = vshrl.u32 %v4031_v24, 16 }
  0x6a   : > { %v1593_v0 = vsel %vm1558_vm4, %v1583_v48, %v1592_v60 }
  0x73   : > { %3667 = vmatmul.msk.bf16.gmra.mxu1 %vm533_vm2, %v4471_v55  ;;  %3673 = vmatmul.msk.bf16.gmra.mxu2 %vm533_vm2, %v513_v21  ;;  %v1297_v55 = vsel %vm880_vm3, %v1294_v63, %v1296_v17  ;;  %v882_v21 = vrot.slane %v4358_v13, 1  ;;  %v1600_v17 = vrot.slane %v1598_v4, 2 }
  0x74   : > { %3661 = vmatmul.msk.bf16.gmra.mxu0 %vm533_vm2, %v417_v25  ;;  %v1566_v25 = vor.u32 %v1565_v20, %v1562_v19  ;;  %v888_v19 = vrot.slane %v4456_v45, 1 }
  0x75   : > { %v883_v49 = vsel %vm880_vm3, %v881_v29, %v882_v21  ;;  %v1601_v20 = vor.u32 %v1600_v17, %v1597_v16 }
  0x76   : > { %v1575_v28 = vsel %vm1558_vm4, %v1566_v25, %v1574_v32  ;;  %v1604_v32 = vshrl.u32 %v4030_v53, 16 }
  0x78   : > { %3799 = vmatmul.msk.bf16.gmra.mxu3 %vm533_vm2, %v1297_v55  ;;  %v889_v55 = vsel %vm880_vm3, %v886_v58, %v888_v19  ;;  %v1606_v38 = vrot.slane %v1604_v32, 1  ;;  %v1622_v32 = vshrl.u32 %v4032_v34, 16 }
  0x83   : > { %3677 = vmatmul.msk.bf16.vlgmr.msrb.gmra.mxu1 %vm533_vm2, %v4355_v12  ;;  %3699 = vmatmul.msk.bf16.vlgmr.msrb.gmra.mxu2 %vm533_vm2, %v883_v49  ;;  %v885_v12 = vsel %vm880_vm3, %v882_v21, %v884_v44  ;;  %v1602_v21 = vsel %vm1558_vm4, %v1592_v60, %v1601_v20  ;;  %v1607_v49 = vshll.u32 %v4030_v53, 16  ;;  %v4033_v60 = vld [vmem:[%s4340_s11 + $0x48] sm:$0xff] }
  0x84   : > { %3819 = vmatmul.msk.bf16.vlgmr.msrb.gmra.mxu0 %vm533_vm2, %v1575_v28  ;;  %v1306_v16 = vrot.slane %v4033_v60, 1 }
  0x85   : > { %v1609_v22 = vrot.slane %v1607_v49, 2  ;;  %v1625_v49 = vshll.u32 %v4032_v34, 16 }
  0x87   : > { %v1610_v48 = vor.u32 %v1609_v22, %v1606_v38 }
  0x88   : > { %3800 = vmatmul.msk.bf16.gmra.mxu3 %vm533_vm2, %v1299_v47 }
  0x89   : > { %v1611_v53 = vsel %vm1558_vm4, %v1601_v20, %v1610_v48 }
  0x93   : > { %3678 = vmatmul.msk.bf16.gmra.mxu1 %vm533_vm2, %v4358_v13  ;;  %3700 = vmatmul.msk.bf16.gmra.mxu2 %vm533_vm2, %v885_v12  ;;  %v887_v13 = vsel %vm880_vm3, %v884_v44, %v886_v58  ;;  %v1304_v44 = vrot.slane %v4032_v34, 1 }
  0x94   : > { %3820 = vmatmul.msk.bf16.gmra.mxu0 %vm533_vm2, %v1584_v50 }
  0x95   : > { %v1305_v47 = vsel %vm880_vm3, %v1302_v18, %v1304_v44  ;;  %v1307_v17 = vsel %vm880_vm3, %v1304_v44, %v1306_v16  ;;  %v4034_v44 = vld [vmem:[%s4340_s11 + $0x50] sm:$0xff] }
  0x98   : > { %3801 = vmatmul.msk.bf16.gmra.mxu3 %vm533_vm2, %v1301_v59 }
  0xa0   : > { %v4558_v61 = vpop.f32.mrf.mxu1 }
  0xa1   : > { %v4561_v63 = vpop.f32.mrf.mxu0 }
  0xa3   : > { %3679 = vmatmul.msk.bf16.gmra.mxu1 %vm533_vm2, %v4390_v39  ;;  %3701 = vmatmul.msk.bf16.gmra.mxu2 %vm533_vm2, %v887_v13  ;;  %v1303_v39 = vsel %vm880_vm3, %v1300_v57, %v1302_v18  ;;  %v1616_v57 = vshll.u32 %v4031_v24, 16 }
  0xa4   : > { %3821 = vmatmul.msk.bf16.gmra.mxu0 %vm533_vm2, %v1593_v0  ;;  %v1615_v0 = vrot.slane %v1613_v56, 1  ;;  %v894_v56 = vrot.slane %v4346_v9, 1 }
  0xa5   : > { %v1618_v2 = vrot.slane %v1616_v57, 2 }
  0xa6   : > { %v4568_v5 = vpop.f32.mrf.mxu2 }
  0xa7   : > { %v1619_v18 = vor.u32 %v1618_v2, %v1615_v0 }
  0xa8   : > { %v4570_v7 = vpop.f32.mrf.mxu1  ;;  %3802 = vmatmul.msk.bf16.gmra.mxu3 %vm533_vm2, %v1303_v39 }
  0xa9   : > { %v4573_v15 = vpop.f32.mrf.mxu0 }
  0xab   : > { %v4586_v25 = vpop.f32.mrf.mxu3 }
  0xac   : > { %5713 = vst [vmem:[#allocation6_spill] sm:$0xff] %v4586_v25 }
  0xae   : > { %v4577_v23 = vpop.f32.mrf.mxu2 }
  0xaf   : > { %5712 = vst [vmem:[#allocation5_spill] sm:$0xff] %v4577_v23 }
  0xb0   : > { %v4580_v26 = vpop.f32.mrf.mxu1 }
  0xb1   : > { %v4583_v29 = vpop.f32.mrf.mxu0 }
  0xb3   : > { %3680 = vmatmul.msk.bf16.gmra.mxu1 %vm533_vm2, %v4423_v6  ;;  %3702 = vmatmul.msk.bf16.gmra.mxu2 %vm533_vm2, %v889_v55  ;;  %v4599_v40 = vpop.f32.mrf.mxu3  ;;  %v890_v6 = vrot.slane %v4467_v54, 1  ;;  %v1620_v55 = vsel %vm1558_vm4, %v1610_v48, %v1619_v18  ;;  %v1627_v48 = vrot.slane %v1625_v49, 2 }
  0xb4   : > { %3822 = vmatmul.msk.bf16.gmra.mxu0 %vm533_vm2, %v1602_v21  ;;  %5715 = vst [vmem:[#allocation8_spill] sm:$0xff] %v4599_v40 }
  0xb5   : > { %v891_v51 = vsel %vm880_vm3, %v888_v19, %v890_v6 }
  0xb6   : > { %v4592_v28 = vpop.f32.mrf.mxu2 }
  0xb7   : > { %5714 = vst [vmem:[#allocation7_spill] sm:$0xff] %v4592_v28 }
  0xb8   : > { %v4594_v33 = vpop.f32.mrf.mxu1  ;;  %3803 = vmatmul.msk.bf16.gmra.mxu3 %vm533_vm2, %v1305_v47  ;;  %v1624_v47 = vrot.slane %v1622_v32, 1  ;;  %v1634_v32 = vshll.u32 %v4033_v60, 16 }
  0xb9   : > { %v4597_v37 = vpop.f32.mrf.mxu0 }
  0xba   : > { %v1628_v57 = vor.u32 %v1627_v48, %v1624_v47  ;;  %v4035_v48 = vld [vmem:[%s4340_s11 + $0x58] sm:$0xff] }
  0xbb   : > { %v4612_v43 = vpop.f32.mrf.mxu3  ;;  %v1310_v30 = vrot.slane %v4035_v48, 1 }
  0xbc   : > { %5717 = vst [vmem:[#allocation10_spill] sm:$0xff] %v4612_v43 }
  0xbe   : > { %v4603_v12 = vpop.f32.mrf.mxu2 }
  0xbf   : > { %5716 = vst [vmem:[#allocation9_spill] sm:$0xff] %v4603_v12 }
  0xc0   : > { %v4606_v50 = vpop.f32.mrf.mxu1 }
  0xc1   : > { %v4609_v52 = vpop.f32.mrf.mxu0 }
  0xc3   : > { %3681 = vmatmul.msk.bf16.gmra.mxu1 %vm533_vm2, %v4456_v45  ;;  %3703 = vmatmul.msk.bf16.gmra.mxu2 %vm533_vm2, %v891_v51  ;;  %v4625_v4 = vpop.f32.mrf.mxu3  ;;  %v892_v45 = vrot.slane %v4343_v8, 1 }
  0xc4   : > { %3823 = vmatmul.msk.bf16.gmra.mxu0 %vm533_vm2, %v1611_v53  ;;  %5719 = vst [vmem:[#allocation12_spill] sm:$0xff] %v4625_v4  ;;  %v1308_v53 = vrot.slane %v4034_v44, 1 }
  0xc5   : > { %v893_v39 = vsel %vm880_vm3, %v890_v6, %v892_v45  ;;  %v895_v2 = vsel %vm880_vm3, %v892_v45, %v894_v56 }
  0xc6   : > { %v4618_v58 = vpop.f32.mrf.mxu2 }
  0xc7   : > { %5718 = vst [vmem:[#allocation11_spill] sm:$0xff] %v4618_v58 }
  0xc8   : > { %v4620_v59 = vpop.f32.mrf.mxu1  ;;  %3804 = vmatmul.msk.bf16.gmra.mxu3 %vm533_vm2, %v1307_v17 }
  0xc9   : > { %v4623_v13 = vpop.f32.mrf.mxu0 }
  0xcb   : > { %v4638_v21 = vpop.f32.mrf.mxu3 }
  0xcc   : > { %5721 = vst [vmem:[#allocation14_spill] sm:$0xff] %v4638_v21  ;;  %v896_v21 = vrot.slane %v4381_v35, 1 }
  0xce   : > { %v4629_v19 = vpop.f32.mrf.mxu2  ;;  %v897_v4 = vsel %vm880_vm3, %v894_v56, %v896_v21  ;;  %v4036_v56 = vld [vmem:[%s4340_s11 + $0x60] sm:$0xff] }
  0xcf   : > { %5720 = vst [vmem:[#allocation13_spill] sm:$0xff] %v4629_v19 }
  0xd0   : > { %v4632_v24 = vpop.f32.mrf.mxu1 }
  0xd1   : > { %v4635_v20 = vpop.f32.mrf.mxu0 }
  0xd3   : > { %3682 = vmatmul.msk.bf16.gmra.mxu1 %vm533_vm2, %v4467_v54  ;;  %3704 = vmatmul.msk.bf16.gmra.mxu2 %vm533_vm2, %v893_v39  ;;  %v712_v51 = vpop.f32.mrf.mxu3  ;;  %v1309_v54 = vsel %vm880_vm3, %v1306_v16, %v1308_v53  ;;  %v1629_v39 = vsel %vm1558_vm4, %v1619_v18, %v1628_v57  ;;  %v1631_v16 = vshrl.u32 %v4033_v60, 16 }
  0xd4   : > { %3824 = vmatmul.msk.bf16.gmra.mxu0 %vm533_vm2, %v1620_v55 }
  0xd5   : > { %v1633_v51 = vrot.slane %v1631_v16, 1 }
  0xd6   : > { %v4644_v38 = vpop.f32.mrf.mxu2 }
  0xd7   : > { %5722 = vst [vmem:[#allocation15_spill] sm:$0xff] %v4644_v38 }
  0xd8   : > { %v4646_v22 = vpop.f32.mrf.mxu1  ;;  %3805 = vmatmul.msk.bf16.gmra.mxu3 %vm533_vm2, %v1309_v54  ;;  %v1636_v54 = vrot.slane %v1634_v32, 2 }
  0xd9   : > { %v4649_v6 = vpop.f32.mrf.mxu0 }
  0xdb   : > { %v1407_v55 = vpop.f32.mrf.mxu3 }
  0xde   : > { %v4653_v0 = vpop.f32.mrf.mxu2 }
  0xdf   : > { %5723 = vst [vmem:[#allocation16_spill] sm:$0xff] %v4653_v0 }
  0xe0   : > { %v4656_v34 = vpop.f32.mrf.mxu1 }
  0xe1   : > { %v4659_v17 = vpop.f32.mrf.mxu0 }
  0xe3   : > { %3683 = vmatmul.msk.bf16.gmra.mxu1 %vm533_vm2, %v4343_v8  ;;  %3705 = vmatmul.msk.bf16.gmra.mxu2 %vm533_vm2, %v895_v2  ;;  %v1409_v18 = vpop.f32.mrf.mxu3  ;;  %v1311_v8 = vsel %vm880_vm3, %v1308_v53, %v1310_v30  ;;  %v1637_v2 = vor.u32 %v1636_v54, %v1633_v51  ;;  %v1640_v53 = vshrl.u32 %v4034_v44, 16  ;;  %v1643_v51 = vshll.u32 %v4034_v44, 16 }
  0xe4   : > { %3825 = vmatmul.msk.bf16.gmra.mxu0 %vm533_vm2, %v1629_v39 }
  0xe5   : > { %v1638_v16 = vsel %vm1558_vm4, %v1628_v57, %v1637_v2  ;;  %v1642_v25 = vrot.slane %v1640_v53, 1  ;;  %v1645_v57 = vrot.slane %v1643_v51, 2 }
  0xe6   : > { %v4666_v49 = vpop.f32.mrf.mxu2 }
  0xe7   : > { %5724 = vst [vmem:[#allocation17_spill] sm:$0xff] %v4666_v49  ;;  %v1312_v49 = vrot.slane %v4036_v56, 1  ;;  %v1646_v0 = vor.u32 %v1645_v57, %v1642_v25  ;;  %v1649_v25 = vshrl.u32 %v4035_v48, 16  ;;  %v1652_v57 = vshll.u32 %v4035_v48, 16 }
  0xe8   : > { %v4668_v47 = vpop.f32.mrf.mxu1  ;;  %3806 = vmatmul.msk.bf16.gmra.mxu3 %vm533_vm2, %v1311_v8 }
  0xe9   : > { %v4671_v45 = vpop.f32.mrf.mxu0  ;;  %v1647_v53 = vsel %vm1558_vm4, %v1637_v2, %v1646_v0  ;;  %v1651_v12 = vrot.slane %v1649_v25, 1  ;;  %v1654_v28 = vrot.slane %v1652_v57, 2 }
  0xeb   : > { %v4684_v32 = vpop.f32.mrf.mxu3 }
  0xee   : > { %v4675_v39 = vpop.f32.mrf.mxu2 }
  0xef   : > { %5725 = vst [vmem:[#allocation18_spill] sm:$0xff] %v4675_v39 }
  0xf0   : > { %v4678_v60 = vpop.f32.mrf.mxu1 }
  0xf1   : > { %v4681_v43 = vpop.f32.mrf.mxu0 }
  0xf3   : > { %3684 = vmatmul.msk.bf16.gmra.mxu1 %vm533_vm2, %v4346_v9  ;;  %3706 = vmatmul.msk.bf16.gmra.mxu2 %vm533_vm2, %v897_v4  ;;  %v4697_v39 = vpop.f32.mrf.mxu3  ;;  %v898_v9 = vrot.slane %v4409_v62, 1  ;;  %v1313_v4 = vsel %vm880_vm3, %v1310_v30, %v1312_v49 }
  0xf4   : > { %3826 = vmatmul.msk.bf16.gmra.mxu0 %vm533_vm2, %v1638_v16 }
  0xf6   : > { %v4690_v54 = vpop.f32.mrf.mxu2 }
  0xf7   : > { %5726 = vst [vmem:[#allocation19_spill] sm:$0xff] %v4690_v54  ;;  %v899_v54 = vsel %vm880_vm3, %v896_v21, %v898_v9  ;;  %v4714_v21 = vld [vmem:[%s4340_s11 + $0x68] sm:$0xff] }
  0xf8   : > { %v4692_v8 = vpop.f32.mrf.mxu1  ;;  %3807 = vmatmul.msk.bf16.gmra.mxu3 %vm533_vm2, %v1313_v4 }
  0xf9   : > { %v4695_v40 = vpop.f32.mrf.mxu0 }
  0xfb   : > { %v4706_v51 = vpop.f32.mrf.mxu3 }
  0xfe   : > { %v4701_v16 = vpop.f32.mrf.mxu2 }
  0xff   : > { %5727 = vst [vmem:[#allocation20_spill] sm:$0xff] %v4701_v16 }
 0x100   : > { %v770_v44 = vpop.f32.mrf.mxu1 }
 0x101   : > { %v1822_v38 = vpop.f32.mrf.mxu0  ;;  %v771_v30 = vadd.f32 %v770_v44, %v4561_v63  ;;  %v1655_v44 = vor.u32 %v1654_v28, %v1651_v12  ;;  %v1658_v12 = vshrl.u32 %v4036_v56, 16 }
 0x103   : > { %3685 = vmatmul.msk.bf16.gmra.mxu1 %vm533_vm2, %v4381_v35  ;;  %3707 = vmatmul.msk.bf16.gmra.mxu2 %vm533_vm2, %v899_v54  ;;  %v4716_v23 = vpop.f32.mrf.mxu3  ;;  %v1314_v35 = vrot.slane %v4714_v21, 1 }
 0x104   : > { %3827 = vmatmul.msk.bf16.gmra.mxu0 %vm533_vm2, %v1647_v53  ;;  %v900_v53 = vrot.slane %v4448_v41, 1 }
 0x105   : > { %v1315_v63 = vsel %vm880_vm3, %v1312_v49, %v1314_v35 }
 0x106   : > { %v997_v4 = vpop.f32.mrf.mxu2  ;;  %v901_v25 = vsel %vm880_vm3, %v898_v9, %v900_v53 }
 0x107   : > { %v1101_v16 = vadd.f32 %v997_v4, %v771_v30 }
 0x108   : > { %v772_v19 = vpop.f32.mrf.mxu1  ;;  %3808 = vmatmul.msk.bf16.gmra.mxu3 %vm533_vm2, %v1315_v63  ;;  %v4737_v63 = vld [vmem:[%s4340_s11 + $0x70] sm:$0xff] }
 0x109   : > { %v1511_v58 = vadd.f32 %v1407_v55, %v1101_v16  ;;  %v1824_v2 = vpop.f32.mrf.mxu0  ;;  %v773_v48 = vadd.f32 %v772_v19, %v4573_v15  ;;  %v1661_v19 = vshll.u32 %v4036_v56, 16 }
 0x10b   : > { %v4719_v54 = vadd.f32 %v1822_v38, %v1511_v58  ;;  %v1656_v58 = vsel %vm1558_vm4, %v1646_v0, %v1655_v44  ;;  %v4727_v38 = vpop.f32.mrf.mxu3 }
 0x10e   : > { %v999_v30 = vpop.f32.mrf.mxu2 }
 0x10f   : > { %v1102_v55 = vadd.f32 %v999_v30, %v773_v48  ;;  %v1660_v30 = vrot.slane %v1658_v12, 1 }
 0x110   : > { %v775_v16 = vpop.f32.mrf.mxu1 }
 0x111   : > { %v1512_v57 = vadd.f32 %v1409_v18, %v1102_v55  ;;  %v1827_v4 = vpop.f32.mrf.mxu0  ;;  %v776_v28 = vadd.f32 %v775_v16, %v4583_v29  ;;  %v902_v29 = vrot.slane %v4438_v31, 1 }
 0x113   : > { %3686 = vmatmul.msk.bf16.gmra.mxu1 %vm533_vm2, %v4409_v62  ;;  %3708 = vmatmul.msk.bf16.gmra.mxu2 %vm533_vm2, %v901_v25  ;;  %v4732_v15 = vadd.f32 %v1824_v2, %v1512_v57  ;;  %v1663_v62 = vrot.slane %v1661_v19, 2  ;;  %v4740_v55 = vpop.f32.mrf.mxu3  ;;  %v1316_v2 = vrot.slane %v4737_v63, 1  ;;  %v903_v12 = vsel %vm880_vm3, %v900_v53, %v902_v29 }
 0x114   : > { %3828 = vmatmul.msk.bf16.gmra.mxu0 %vm533_vm2, %v1656_v58  ;;  %v1667_v53 = vshrl.u32 %v4714_v21, 16 }
 0x115   : > { %v1317_v56 = vsel %vm880_vm3, %v1314_v35, %v1316_v2  ;;  %v1664_v57 = vor.u32 %v1663_v62, %v1660_v30  ;;  %v4764_v30 = vld [vmem:[%s4340_s11 + $0x78] sm:$0xff] }
 0x116   : > { %v1002_v49 = vpop.f32.mrf.mxu2 }
 0x117   : > { %v1103_v18 = vadd.f32 %v1002_v49, %v776_v28 }
 0x118   : > { %v777_v9 = vpop.f32.mrf.mxu1  ;;  %3809 = vmatmul.msk.bf16.gmra.mxu3 %vm533_vm2, %v1317_v56  ;;  %v1669_v56 = vrot.slane %v1667_v53, 1 }
 0x119   : > { %v1513_v0 = vadd.f32 %v4684_v32, %v1103_v18  ;;  %v1829_v48 = vpop.f32.mrf.mxu0  ;;  %v778_v16 = vadd.f32 %v777_v9, %v4597_v37 }
 0x11b   : > { %v4743_v25 = vadd.f32 %v1827_v4, %v1513_v0  ;;  %v1665_v4 = vsel %vm1558_vm4, %v1655_v44, %v1664_v57  ;;  %v4752_v18 = vpop.f32.mrf.mxu3 }
 0x11e   : > { %v1004_v58 = vpop.f32.mrf.mxu2 }
 0x11f   : > { %v1104_v32 = vadd.f32 %v1004_v58, %v778_v16  ;;  %v1318_v58 = vrot.slane %v4764_v30, 1 }
 0x120   : > { %v780_v28 = vpop.f32.mrf.mxu1 }
 0x121   : > { %v1514_v19 = vadd.f32 %v4697_v39, %v1104_v32  ;;  %v1832_v49 = vpop.f32.mrf.mxu0  ;;  %v781_v35 = vadd.f32 %v780_v28, %v4609_v52  ;;  %v1670_v39 = vshll.u32 %v4714_v21, 16  ;;  %v904_v52 = vrot.slane %v4349_v10, 1 }
 0x122   : > { %v1319_v21 = vsel %vm880_vm3, %v1316_v2, %v1318_v58 }
 0x123   : > { %3687 = vmatmul.msk.bf16.gmra.mxu1 %vm533_vm2, %v4448_v41  ;;  %3709 = vmatmul.msk.bf16.gmra.mxu2 %vm533_vm2, %v903_v12  ;;  %v4757_v37 = vadd.f32 %v1829_v48, %v1514_v19  ;;  %v1672_v16 = vrot.slane %v1670_v39, 2  ;;  %v4767_v48 = vpop.f32.mrf.mxu3 }
 0x124   : > { %3829 = vmatmul.msk.bf16.gmra.mxu0 %vm533_vm2, %v1665_v4 }
 0x125   : > { %v1673_v12 = vor.u32 %v1672_v16, %v1669_v56 }
 0x126   : > { %v1007_v9 = vpop.f32.mrf.mxu2 }
 0x127   : > { %v1105_v0 = vadd.f32 %v1007_v9, %v781_v35  ;;  %v905_v35 = vsel %vm880_vm3, %v902_v29, %v904_v52  ;;  %v1676_v29 = vshrl.u32 %v4737_v63, 16 }
 0x128   : > { %v782_v44 = vpop.f32.mrf.mxu1  ;;  %3810 = vmatmul.msk.bf16.gmra.mxu3 %vm533_vm2, %v1319_v21 }
 0x129   : > { %v1515_v62 = vadd.f32 %v4706_v51, %v1105_v0  ;;  %v1834_v41 = vpop.f32.mrf.mxu0  ;;  %v783_v28 = vadd.f32 %v782_v44, %v4623_v13  ;;  %v1678_v16 = vrot.slane %v1676_v29, 1 }
 0x12b   : > { %v4770_v32 = vadd.f32 %v1832_v49, %v1515_v62  ;;  %v1674_v49 = vsel %vm1558_vm4, %v1664_v57, %v1673_v12  ;;  %v4779_v9 = vpop.f32.mrf.mxu3  ;;  %v4791_v62 = vld [vmem:[%s4340_s11 + $0x80] sm:$0xff] }
 0x12e   : > { %v1009_v19 = vpop.f32.mrf.mxu2 }
 0x12f   : > { %v1106_v51 = vadd.f32 %v1009_v19, %v783_v28  ;;  %v1320_v28 = vrot.slane %v4791_v62, 1 }
 0x130   : > { %v785_v4 = vpop.f32.mrf.mxu1 }
 0x131   : > { %v1516_v53 = vadd.f32 %v4716_v23, %v1106_v51  ;;  %v1837_v39 = vpop.f32.mrf.mxu0  ;;  %v786_v2 = vadd.f32 %v785_v4, %v4635_v20  ;;  %v1679_v23 = vshll.u32 %v4737_v63, 16  ;;  %v906_v20 = vrot.slane %v4352_v11, 1 }
 0x132   : > { %v1321_v63 = vsel %vm880_vm3, %v1318_v58, %v1320_v28  ;;  %v1685_v58 = vshrl.u32 %v4764_v30, 16 }
 0x133   : > { %3688 = vmatmul.msk.bf16.gmra.mxu1 %vm533_vm2, %v4438_v31  ;;  %3710 = vmatmul.msk.bf16.gmra.mxu2 %vm533_vm2, %v905_v35  ;;  %v4784_v13 = vadd.f32 %v1834_v41, %v1516_v53  ;;  %v1681_v21 = vrot.slane %v1679_v23, 2  ;;  %v4794_v41 = vpop.f32.mrf.mxu3 }
 0x134   : > { %3830 = vmatmul.msk.bf16.gmra.mxu0 %vm533_vm2, %v1674_v49  ;;  %v907_v49 = vsel %vm880_vm3, %v904_v52, %v906_v20 }
 0x135   : > { %v1682_v4 = vor.u32 %v1681_v21, %v1678_v16 }
 0x136   : > { %v1012_v0 = vpop.f32.mrf.mxu2 }
 0x137   : > { %v1107_v44 = vadd.f32 %v1012_v0, %v786_v2 }
 0x138   : > { %v787_v57 = vpop.f32.mrf.mxu1  ;;  %3811 = vmatmul.msk.bf16.gmra.mxu3 %vm533_vm2, %v1321_v63  ;;  %v908_v63 = vrot.slane %v4385_v36, 1  ;;  %v4135_v36 = vld [vmem:[%s4340_s11 + $0x68] sm:$0xff] }
 0x139   : > { %v1517_v56 = vadd.f32 %v4727_v38, %v1107_v44  ;;  %v1839_v31 = vpop.f32.mrf.mxu0  ;;  %v788_v51 = vadd.f32 %v787_v57, %v4649_v6  ;;  %v4818_v44 = vld [vmem:[%s4340_s11 + $0x88] sm:$0xff] }
 0x13a   : > { %v1322_v21 = vrot.slane %v4818_v44, 1 }
 0x13b   : > { %v4797_v19 = vadd.f32 %v1837_v39, %v1517_v56  ;;  %v1683_v39 = vsel %vm1558_vm4, %v1673_v12, %v1682_v4  ;;  %v4806_v23 = vpop.f32.mrf.mxu3  ;;  %v1687_v56 = vrot.slane %v1685_v58, 1 }
 0x13e   : > { %v1014_v35 = vpop.f32.mrf.mxu2 }
 0x13f   : > { %v1108_v38 = vadd.f32 %v1014_v35, %v788_v51 }
 0x140   : > { %v790_v53 = vpop.f32.mrf.mxu1 }
 0x141   : > { %v1518_v2 = vadd.f32 %v4740_v55, %v1108_v38  ;;  %v1842_v29 = vpop.f32.mrf.mxu0  ;;  %v791_v6 = vadd.f32 %v790_v53, %v4659_v17  ;;  %v1688_v55 = vshll.u32 %v4764_v30, 16  ;;  %v1323_v30 = vsel %vm880_vm3, %v1320_v28, %v1322_v21 }
 0x143   : > { %3689 = vmatmul.msk.bf16.gmra.mxu1 %vm533_vm2, %v4349_v10  ;;  %3711 = vmatmul.msk.bf16.gmra.mxu2 %vm533_vm2, %v907_v49  ;;  %v4811_v11 = vadd.f32 %v1839_v31, %v1518_v2  ;;  %v1690_v16 = vrot.slane %v1688_v55, 2  ;;  %v4821_v31 = vpop.f32.mrf.mxu3  ;;  %v909_v49 = vsel %vm880_vm3, %v906_v20, %v908_v63  ;;  %v1694_v20 = vshrl.u32 %v4791_v62, 16 }
 0x144   : > { %3831 = vmatmul.msk.bf16.gmra.mxu0 %vm533_vm2, %v1683_v39 }
 0x145   : > { %v1691_v35 = vor.u32 %v1690_v16, %v1687_v56 }
 0x146   : > { %v1017_v52 = vpop.f32.mrf.mxu2 }
 0x147   : > { %v1109_v0 = vadd.f32 %v1017_v52, %v791_v6  ;;  %v4845_v52 = vld [vmem:[%s4340_s11 + $0x90] sm:$0xff] }
 0x148   : > { %v792_v12 = vpop.f32.mrf.mxu1  ;;  %3812 = vmatmul.msk.bf16.gmra.mxu3 %vm533_vm2, %v1323_v30  ;;  %v1324_v16 = vrot.slane %v4845_v52, 1  ;;  %v910_v30 = vrot.slane %v4415_v1, 1  ;;  %v4136_v1 = vld [vmem:[%s4340_s11 + $0x70] sm:$0xff] }
 0x149   : > { %v1519_v57 = vadd.f32 %v4752_v18, %v1109_v0  ;;  %v1844_v10 = vpop.f32.mrf.mxu0  ;;  %v793_v51 = vadd.f32 %v792_v12, %v4671_v45 }
 0x14b   : > { %v4824_v17 = vadd.f32 %v1842_v29, %v1519_v57  ;;  %v1692_v29 = vsel %vm1558_vm4, %v1682_v4, %v1691_v35  ;;  %v4833_v6 = vpop.f32.mrf.mxu3  ;;  %v1696_v57 = vrot.slane %v1694_v20, 1 }
 0x14e   : > { %v1019_v38 = vpop.f32.mrf.mxu2 }
 0x14f   : > { %v1110_v18 = vadd.f32 %v1019_v38, %v793_v51 }
 0x150   : > { %v795_v53 = vpop.f32.mrf.mxu1 }
 0x151   : > { %v1520_v2 = vadd.f32 %v4767_v48, %v1110_v18  ;;  %v1847_v39 = vpop.f32.mrf.mxu0  ;;  %v796_v28 = vadd.f32 %v795_v53, %v4681_v43  ;;  %v1697_v48 = vshll.u32 %v4791_v62, 16  ;;  %v1325_v62 = vsel %vm880_vm3, %v1322_v21, %v1324_v16 }
 0x153   : > { %3690 = vmatmul.msk.bf16.gmra.mxu1 %vm533_vm2, %v4135_v36  ;;  %3712 = vmatmul.msk.bf16.gmra.mxu2 %vm533_vm2, %v909_v49  ;;  %v4838_v45 = vadd.f32 %v1844_v10, %v1520_v2  ;;  %v1699_v56 = vrot.slane %v1697_v48, 2  ;;  %v4848_v10 = vpop.f32.mrf.mxu3  ;;  %v911_v49 = vsel %vm880_vm3, %v908_v63, %v910_v30  ;;  %v1703_v63 = vshrl.u32 %v4818_v44, 16  ;;  %v4872_v48 = vld [vmem:[%s4340_s11 + $0x98] sm:$0xff] }
 0x154   : > { %3832 = vmatmul.msk.bf16.gmra.mxu0 %vm533_vm2, %v1692_v29 }
 0x155   : > { %v1700_v38 = vor.u32 %v1699_v56, %v1696_v57  ;;  %v1326_v57 = vrot.slane %v4872_v48, 1  ;;  %v912_v56 = vrot.slane %v4452_v42, 1  ;;  %v4137_v42 = vld [vmem:[%s4340_s11 + $0x78] sm:$0xff] }
 0x156   : > { %v1022_v58 = vpop.f32.mrf.mxu2 }
 0x157   : > { %v1111_v55 = vadd.f32 %v1022_v58, %v796_v28 }
 0x158   : > { %v797_v4 = vpop.f32.mrf.mxu1  ;;  %3813 = vmatmul.msk.bf16.gmra.mxu3 %vm533_vm2, %v1325_v62 }
 0x159   : > { %v1521_v0 = vadd.f32 %v4779_v9, %v1111_v55  ;;  %v1849_v12 = vpop.f32.mrf.mxu0  ;;  %v798_v51 = vadd.f32 %v797_v4, %v4695_v40  ;;  %v1705_v4 = vrot.slane %v1703_v63, 1  ;;  %v4899_v63 = vld [vmem:[%s4340_s11 + $0xa0] sm:$0xff] }
 0x15b   : > { %v4851_v43 = vadd.f32 %v1847_v39, %v1521_v0  ;;  %v1701_v39 = vsel %vm1558_vm4, %v1691_v35, %v1700_v38  ;;  %v4860_v36 = vpop.f32.mrf.mxu3 }
 0x15e   : > { %v1024_v18 = vpop.f32.mrf.mxu2 }
 0x15f   : > { %v1112_v9 = vadd.f32 %v1024_v18, %v798_v51 }
 0x160   : > { %v800_v53 = vpop.f32.mrf.mxu1 }
 0x161   : > { %v1522_v2 = vadd.f32 %v4794_v41, %v1112_v9  ;;  %v1852_v29 = vpop.f32.mrf.mxu0  ;;  %v801_v21 = vadd.f32 %v800_v53, %v4558_v61  ;;  %v1706_v41 = vshll.u32 %v4818_v44, 16  ;;  %v1327_v44 = vsel %vm880_vm3, %v1324_v16, %v1326_v57 }
 0x162   : > { %v913_v53 = vsel %vm880_vm3, %v910_v30, %v912_v56  ;;  %v1712_v30 = vshrl.u32 %v4845_v52, 16 }
 0x163   : > { %3691 = vmatmul.msk.bf16.gmra.mxu1 %vm533_vm2, %v4136_v1  ;;  %3713 = vmatmul.msk.bf16.gmra.mxu2 %vm533_vm2, %v911_v49  ;;  %v4865_v40 = vadd.f32 %v1849_v12, %v1522_v2  ;;  %v1708_v0 = vrot.slane %v1706_v41, 2  ;;  %v4875_v12 = vpop.f32.mrf.mxu3 }
 0x164   : > { %3833 = vmatmul.msk.bf16.gmra.mxu0 %vm533_vm2, %v1701_v39 }
 0x165   : > { %v1709_v51 = vor.u32 %v1708_v0, %v1705_v4  ;;  %v914_v4 = vrot.slane %v4459_v46, 1 }
 0x166   : > { %v1027_v28 = vpop.f32.mrf.mxu2 }
 0x167   : > { %v1113_v20 = vadd.f32 %v1027_v28, %v801_v21 }
 0x168   : > { %v802_v35 = vpop.f32.mrf.mxu1  ;;  %3814 = vmatmul.msk.bf16.gmra.mxu3 %vm533_vm2, %v1327_v44 }
 0x169   : > { %v1523_v58 = vadd.f32 %v4806_v23, %v1113_v20  ;;  %v1854_v55 = vpop.f32.mrf.mxu0  ;;  %v803_v62 = vadd.f32 %v802_v35, %v4570_v7  ;;  %v1714_v20 = vrot.slane %v1712_v30, 1 }
 0x16b   : > { %v4878_v61 = vadd.f32 %v1852_v29, %v1523_v58  ;;  %v1710_v29 = vsel %vm1558_vm4, %v1700_v38, %v1709_v51  ;;  %v4887_v39 = vpop.f32.mrf.mxu3 }
 0x16e   : > { %v1029_v18 = vpop.f32.mrf.mxu2 }
 0x16f   : > { %v1114_v23 = vadd.f32 %v1029_v18, %v803_v62 }
 0x170   : > { %v805_v9 = vpop.f32.mrf.mxu1 }
 0x171   : > { %v1524_v49 = vadd.f32 %v4821_v31, %v1114_v23  ;;  %v1857_v2 = vpop.f32.mrf.mxu0  ;;  %v806_v16 = vadd.f32 %v805_v9, %v4580_v26  ;;  %v1715_v31 = vshll.u32 %v4845_v52, 16  ;;  %v915_v23 = vsel %vm880_vm3, %v912_v56, %v914_v4 }
 0x172   : > { %v1721_v56 = vshrl.u32 %v4872_v48, 16 }
 0x173   : > { %3692 = vmatmul.msk.bf16.gmra.mxu1 %vm533_vm2, %v4137_v42  ;;  %3714 = vmatmul.msk.bf16.gmra.mxu2 %vm533_vm2, %v913_v53  ;;  %v4892_v7 = vadd.f32 %v1854_v55, %v1524_v49  ;;  %v1717_v35 = vrot.slane %v1715_v31, 2  ;;  %v4902_v58 = vpop.f32.mrf.mxu3  ;;  %v1328_v55 = vrot.slane %v4899_v63, 1 }
 0x174   : > { %3834 = vmatmul.msk.bf16.gmra.mxu0 %vm533_vm2, %v1710_v29  ;;  %v1182_v29 = vld [vmem:[%s4340_s11 + $0xa8] sm:$0xf] }
 0x175   : > { %v1329_v52 = vsel %vm880_vm3, %v1326_v57, %v1328_v55  ;;  %v1718_v44 = vor.u32 %v1717_v35, %v1714_v20  ;;  %v4138_v57 = vld [vmem:[%s4340_s11 + $0x80] sm:$0xff] }
 0x176   : > { %v1032_v1 = vpop.f32.mrf.mxu2 }
 0x177   : > { %v1115_v21 = vadd.f32 %v1032_v1, %v806_v16  ;;  %v1719_v49 = vsel %vm1558_vm4, %v1709_v51, %v1718_v44  ;;  %v1183_v51 = vld [vmem:[%s4340_s11 + $0xac] sm:$0x1]  ;;  %v1268_v16 = vunpack.c.l.b16 %v1182_v29 }
 0x178   : > { %v807_v38 = vpop.f32.mrf.mxu1  ;;  %3815 = vmatmul.msk.bf16.gmra.mxu3 %vm533_vm2, %v1329_v52  ;;  %v1269_v30 = vunpack.c.l.b16 %v1183_v51 }
 0x179   : > { %v1525_v41 = vadd.f32 %v4833_v6, %v1115_v21  ;;  %v1859_v28 = vpop.f32.mrf.mxu0  ;;  %v808_v0 = vadd.f32 %v807_v38, %v4594_v33 }
 0x17a   : > { %v1290_v21 = vpack.c.b16 %v1269_v30, %v1268_v16 }
 0x17b   : > { %v4905_v26 = vadd.f32 %v1857_v2, %v1525_v41  ;;  %v4914_v46 = vpop.f32.mrf.mxu3 }
 0x17e   : > { %v1034_v62 = vpop.f32.mrf.mxu2 }
 0x17f   : > { %v1116_v6 = vadd.f32 %v1034_v62, %v808_v0 }
 0x180   : > { %v810_v18 = vpop.f32.mrf.mxu1 }
 0x181   : > { %v1526_v9 = vadd.f32 %v4848_v10, %v1116_v6  ;;  %v1862_v53 = vpop.f32.mrf.mxu0  ;;  %v811_v2 = vadd.f32 %v810_v18, %v4606_v50  ;;  %v1724_v10 = vshll.u32 %v4872_v48, 16  ;;  %v1330_v50 = vrot.slane %v1290_v21, 1  ;;  %v4139_v48 = vld [vmem:[%s4340_s11 + $0x90] sm:$0xff] }
 0x182   : > { %v916_v0 = vrot.slane %v4139_v48, 1 }
 0x183   : > { %3693 = vmatmul.msk.bf16.gmra.mxu1 %vm533_vm2, %v4138_v57  ;;  %3715 = vmatmul.msk.bf16.gmra.mxu2 %vm533_vm2, %v915_v23  ;;  %v4919_v33 = vadd.f32 %v1859_v28, %v1526_v9  ;;  %v1723_v28 = vrot.slane %v1721_v56, 1  ;;  %v1726_v20 = vrot.slane %v1724_v10, 2  ;;  %v4928_v35 = vpop.f32.mrf.mxu3  ;;  %v1331_v62 = vsel %vm880_vm3, %v1328_v55, %v1330_v50  ;;  %v4140_v10 = vld [vmem:[%s4340_s11 + $0x88] sm:$0xff] }
 0x184   : > { %3835 = vmatmul.msk.bf16.gmra.mxu0 %vm533_vm2, %v1719_v49  ;;  %v917_v49 = vsel %vm880_vm3, %v914_v4, %v916_v0  ;;  %v1733_v4 = vshll.u32 %v4899_v63, 16 }
 0x185   : > { %v1727_v18 = vor.u32 %v1726_v20, %v1723_v28  ;;  %v4141_v28 = vld [vmem:[%s4340_s11 + $0x98] sm:$0xff] }
 0x186   : > { %v1037_v42 = vpop.f32.mrf.mxu2 }
 0x187   : > { %v1117_v31 = vadd.f32 %v1037_v42, %v811_v2 }
 0x188   : > { %v812_v1 = vpop.f32.mrf.mxu1  ;;  %3816 = vmatmul.msk.bf16.gmra.mxu3 %vm533_vm2, %v1331_v62 }
 0x189   : > { %v1527_v38 = vadd.f32 %v4860_v36, %v1117_v31  ;;  %v1864_v41 = vpop.f32.mrf.mxu0  ;;  %v813_v6 = vadd.f32 %v812_v1, %v4620_v59  ;;  %v1735_v1 = vrot.slane %v1733_v4, 2 }
 0x18b   : > { %v4930_v52 = vadd.f32 %v1862_v53, %v1527_v38  ;;  %v1728_v53 = vsel %vm1558_vm4, %v1718_v44, %v1727_v18  ;;  %v4939_v56 = vpop.f32.mrf.mxu3  ;;  %v1552_v38 = vld [vmem:[%s4340_s11 + $0xac] sm:$0x3] }
 0x18c   : > { %v1556_v62 = vunpack.c.l.b16 %v1552_v38 }
 0x18e   : > { %v1039_v23 = vpop.f32.mrf.mxu2 }
 0x18f   : > { %v1118_v36 = vadd.f32 %v1039_v23, %v813_v6 }
 0x190   : > { %v815_v9 = vpop.f32.mrf.mxu1 }
 0x191   : > { %v1528_v57 = vadd.f32 %v4875_v12, %v1118_v36  ;;  %v1867_v2 = vpop.f32.mrf.mxu0  ;;  %v816_v55 = vadd.f32 %v815_v9, %v4632_v24  ;;  %v1730_v12 = vshrl.u32 %v4899_v63, 16  ;;  %v918_v24 = vrot.slane %v4141_v28, 1 }
 0x193   : > { %3694 = vmatmul.msk.bf16.gmra.mxu1 %vm533_vm2, %v4140_v10  ;;  %3716 = vmatmul.msk.bf16.gmra.mxu2 %vm533_vm2, %v917_v49  ;;  %v4944_v59 = vadd.f32 %v1864_v41, %v1528_v57  ;;  %v1732_v31 = vrot.slane %v1730_v12, 1  ;;  %v4951_v21 = vpop.f32.mrf.mxu3  ;;  %v919_v36 = vsel %vm880_vm3, %v916_v0, %v918_v24  ;;  %v4968_v10 = vld [vmem:[%s4340_s11 + $0x14] sm:$0xf] }
 0x194   : > { %3836 = vmatmul.msk.bf16.gmra.mxu0 %vm533_vm2, %v1728_v53 }
 0x195   : > { %v1736_v63 = vor.u32 %v1735_v1, %v1732_v31 }
 0x196   : > { %v1042_v44 = vpop.f32.mrf.mxu2 }
 0x197   : > { %v1119_v29 = vadd.f32 %v1042_v44, %v816_v55  ;;  %v1737_v57 = vsel %vm1558_vm4, %v1727_v18, %v1736_v63 }
 0x198   : > { %v817_v51 = vpop.f32.mrf.mxu1  ;;  %3817 = vmatmul.msk.bf16.gmra.mxu3 %vm533_vm2, %v1330_v50  ;;  %v2322_v50 = vunpack.c.l.b16 %v4968_v10 }
 0x199   : > { %v1529_v42 = vadd.f32 %v4887_v39, %v1119_v29  ;;  %v1869_v30 = vpop.f32.mrf.mxu0  ;;  %v818_v20 = vadd.f32 %v817_v51, %v4646_v22  ;;  %v2235_v22 = vld [vmem:[%s4340_s11 + $0x10] sm:$0xc] }
 0x19a   : > { %v2321_v55 = vunpack.c.l.b16 %v2235_v22 }
 0x19b   : > { %v4954_v41 = vadd.f32 %v1867_v2, %v1529_v42  ;;  %v4962_v2 = vpack.c.b16 %v1556_v62, %v1268_v16  ;;  %v4964_v53 = vpop.f32.mrf.mxu3 }
 0x19c   : > { %v4981_v16 = vpack.c.b16 %v2322_v50, %v2321_v55  ;;  %v920_v55 = vrot.slane %v4427_v14, 1 }
 0x19d   : > { %v1739_v12 = vshrl.u32 %v4962_v2, 16  ;;  %v1742_v4 = vshll.u32 %v4962_v2, 16 }
 0x19e   : > { %v1044_v6 = vpop.f32.mrf.mxu2  ;;  %v2656_v29 = vshll.u32 %v4981_v16, 16 }
 0x19f   : > { %v1120_v39 = vadd.f32 %v1044_v6, %v818_v20 }
 0x1a0   : > { %v820_v23 = vpop.f32.mrf.mxu1  ;;  %v2658_v38 = vrot.slane %v2656_v29, 3 }
 0x1a1   : > { %v1530_v9 = vadd.f32 %v4902_v58, %v1120_v39  ;;  %v1872_v49 = vpop.f32.mrf.mxu0  ;;  %v4977_v58 = vld [vmem:[%s4340_s11 + $0x18] sm:$0xff]  ;;  %v821_v18 = vadd.f32 %v820_v23, %v4656_v34  ;;  %v1741_v39 = vrot.slane %v1739_v12, 1  ;;  %v1744_v23 = vrot.slane %v1742_v4, 2 }
 0x1a2   : > { %v2661_v51 = vshrl.u32 %v4977_v58, 16  ;;  %v2664_v42 = vshll.u32 %v4977_v58, 16  ;;  %v921_v4 = vsel %vm880_vm3, %v918_v24, %v920_v55  ;;  %v3068_v10 = vrot.slane %v4977_v58, 3 }
 0x1a3   : > { %3695 = vmatmul.msk.bf16.gmra.mxu1 %vm533_vm2, %v4139_v48  ;;  %3717 = vmatmul.msk.bf16.gmra.mxu2 %vm533_vm2, %v919_v36  ;;  %v4973_v0 = vadd.f32 %v1869_v30, %v1530_v9  ;;  %v2653_v48 = vshrl.u32 %v4981_v16, 16  ;;  %v4991_v36 = vpop.f32.mrf.mxu3 }
 0x1a4   : > { %3837 = vmatmul.msk.bf16.gmra.mxu0 %vm533_vm2, %v1737_v57  ;;  %v2663_v20 = vrot.slane %v2661_v51, 2  ;;  %v2666_v62 = vrot.slane %v2664_v42, 3 }
 0x1a5   : > { %v2655_v1 = vrot.slane %v2653_v48, 2  ;;  %v1745_v48 = vor.u32 %v1744_v23, %v1741_v39 }
 0x1a6   : > { %v1047_v44 = vpop.f32.mrf.mxu2  ;;  %v2667_v57 = vor.u32 %v2666_v62, %v2663_v20 }
 0x1a7   : > { %v1121_v30 = vadd.f32 %v1047_v44, %v821_v18  ;;  %v2659_v9 = vor.u32 %v2658_v38, %v2655_v1 }
 0x1a8   : > { %v822_v31 = vpop.f32.mrf.mxu1 }
 0x1a9   : > { %v1531_v34 = vadd.f32 %v4914_v46, %v1121_v30  ;;  %v1874_v6 = vpop.f32.mrf.mxu0  ;;  %v2668_v18 = vsel %vm2651_vm5, %v2659_v9, %v2667_v57  ;;  %v823_v44 = vadd.f32 %v822_v31, %v4668_v47  ;;  %v5010_v47 = vld [vmem:[%s4340_s11 + $0x20] sm:$0xff] }
 0x1aa   : > { %3961 = vmatmul.msk.bf16.vlgmr.msra.gmra.mxu3 %vm533_vm2, %v2668_v18  ;;  %v2673_v1 = vshll.u32 %v5010_v47, 16 }
 0x1ab   : > { %v4993_v22 = vadd.f32 %v1872_v49, %v1531_v34  ;;  %v1746_v49 = vsel %vm1558_vm4, %v1736_v63, %v1745_v48  ;;  %v5002_v30 = vpop.f32.mrf.mxu3 }
 0x1ae   : > { %v1049_v29 = vpop.f32.mrf.mxu2 }
 0x1af   : > { %v1122_v46 = vadd.f32 %v1049_v29, %v823_v44  ;;  %v714_v29 = vpack.c.b16 %v4420_v3, %v4420_v3 }
 0x1b0   : > { %v825_v12 = vpop.f32.mrf.mxu1 }
 0x1b1   : > { %v1532_v51 = vadd.f32 %v4928_v35, %v1122_v46  ;;  %v1877_v42 = vpop.f32.mrf.mxu0  ;;  %v826_v31 = vadd.f32 %v825_v12, %v4678_v60  ;;  %v2670_v35 = vshrl.u32 %v5010_v47, 16  ;;  %v1967_v46 = vld [vmem:[%s4340_s11 + $0x8] sm:$0xc] }
 0x1b3   : > { %3696 = vmatmul.msk.bf16.gmra.mxu1 %vm533_vm2, %v4141_v28  ;;  %3718 = vmatmul.msk.bf16.gmra.mxu2 %vm533_vm2, %v921_v4  ;;  %v5006_v14 = vadd.f32 %v1874_v6, %v1532_v51  ;;  %v2672_v20 = vrot.slane %v2670_v35, 2  ;;  %v2675_v28 = vrot.slane %v2673_v1, 3  ;;  %v5016_v6 = vpop.f32.mrf.mxu3 }
 0x1b4   : > { %3838 = vmatmul.msk.bf16.gmra.mxu0 %vm533_vm2, %v1746_v49  ;;  %v5036_v49 = vld [vmem:[%s4340_s11 + $0x28] sm:$0xff] }
 0x1b5   : > { %v2676_v39 = vor.u32 %v2675_v28, %v2672_v20  ;;  %v2682_v35 = vshll.u32 %v5036_v49, 16 }
 0x1b6   : > { %v1052_v24 = vpop.f32.mrf.mxu2 }
 0x1b7   : > { %v1123_v63 = vadd.f32 %v1052_v24, %v826_v31  ;;  %v2677_v60 = vsel %vm2651_vm5, %v2667_v57, %v2676_v39  ;;  %v2679_v24 = vshrl.u32 %v5036_v49, 16  ;;  %v2684_v28 = vrot.slane %v2682_v35, 3  ;;  %v5069_v35 = vld [vmem:[%s4340_s11 + $0x30] sm:$0xff] }
 0x1b8   : > { %v827_v38 = vpop.f32.mrf.mxu1 }
 0x1b9   : > { %v1533_v62 = vadd.f32 %v4939_v56, %v1123_v63  ;;  %v1879_v34 = vpop.f32.mrf.mxu0  ;;  %v828_v9 = vadd.f32 %v827_v38, %v4692_v8  ;;  %v1971_v8 = vunpack.c.l.b16 %v1967_v46  ;;  %v5728_v63 = vunpack.c.l.b16 %v4492_v27 }
 0x1ba   : > { %3962 = vmatmul.msk.bf16.gmra.mxu3 %vm533_vm2, %v2677_v60  ;;  %v2681_v20 = vrot.slane %v2679_v24, 2  ;;  %v2384_v27 = vrot.slane %v4981_v16, 2 }
 0x1bb   : > { %v5018_v23 = vadd.f32 %v1877_v42, %v1533_v62  ;;  %v5027_v51 = vpop.f32.mrf.mxu3  ;;  %v3060_v42 = vld [vmem:[%s4340_s11 + $0x10] sm:$0x8] }
 0x1bc   : > { %v3064_v31 = vunpack.c.l.b16 %v3060_v42  ;;  %v2685_v60 = vor.u32 %v2684_v28, %v2681_v20 }
 0x1be   : > { %v1054_v18 = vpop.f32.mrf.mxu2  ;;  %v2686_v46 = vsel %vm2651_vm5, %v2676_v39, %v2685_v60 }
 0x1bf   : > { %v1124_v44 = vadd.f32 %v1054_v18, %v828_v9 }
 0x1c0   : > { %v830_v56 = vpop.f32.mrf.mxu1 }
 0x1c1   : > { %v1534_v12 = vadd.f32 %v4951_v21, %v1124_v44  ;;  %v1882_v4 = vpop.f32.mrf.mxu0  ;;  %v831_v3 = vadd.f32 %v830_v56, %v4568_v5  ;;  %v3065_v5 = vpack.c.b16 %v2322_v50, %v3064_v31  ;;  %v4142_v44 = vld [vmem:[%s4340_s11 + $0x10] sm:$0xff]  ;;  %v2385_v56 = vrot.slane %v4977_v58, 2 }
 0x1c3   : > { %3697 = vmatmul.msk.bf16.gmra.mxu1 %vm533_vm2, %v714_v29  ;;  %3719 = vmatmul.msk.bf16.gmra.mxu2 %vm533_vm2, %v920_v55  ;;  %v5032_v57 = vadd.f32 %v1879_v34, %v1534_v12  ;;  %v1972_v55 = vpack.c.b16 %v5728_v63, %v1971_v8  ;;  %v5046_v34 = vpop.f32.mrf.mxu3  ;;  %v1975_v29 = vrot.slane %v4142_v44, 2  ;;  %v5729_v12 = vld [vmem:[#allocation5_spill] sm:$0xff]  ;;  %v3067_v42 = vrot.slane %v3065_v5, 3 }
 0x1c4   : > { %3839 = vmatmul.msk.bf16.gmra.mxu0 %vm533_vm2, %v1745_v48  ;;  %v2386_v16 = vsel %vm1973_vm6, %v2384_v27, %v2385_v56 }
 0x1c5   : > { %v1974_v9 = vrot.slane %v1972_v55, 2 }
 0x1c6   : > { %v1057_v21 = vpop.f32.mrf.mxu2 }
 0x1c7   : > { %v1125_v1 = vadd.f32 %v1057_v21, %v831_v3  ;;  %v1976_v3 = vsel %vm1973_vm6, %v1974_v9, %v1975_v29  ;;  %v3069_v21 = vsel %vm3066_vm7, %v3067_v42, %v3068_v10  ;;  %v2387_v42 = vrot.slane %v5010_v47, 2 }
 0x1c8   : > { %v832_v38 = vpop.f32.mrf.mxu1 }
 0x1c9   : > { %v1535_v48 = vadd.f32 %v4964_v53, %v1125_v1  ;;  %v1884_v62 = vpop.f32.mrf.mxu0  ;;  %v833_v53 = vadd.f32 %v832_v38, %v5729_v12  ;;  %v5730_v1 = vld [vmem:[#allocation7_spill] sm:$0xff]  ;;  %v2691_v38 = vshll.u32 %v5069_v35, 16  ;;  %v4143_v12 = vld [vmem:[%s4340_s11 + $0x18] sm:$0xff] }
 0x1ca   : > { %3963 = vmatmul.msk.bf16.gmra.mxu3 %vm533_vm2, %v2686_v46 }
 0x1cb   : > { %v5048_v18 = vadd.f32 %v1882_v4, %v1535_v48  ;;  %v5061_v24 = vpop.f32.mrf.mxu3  ;;  %v2693_v5 = vrot.slane %v2691_v38, 3 }
 0x1ce   : > { %v1059_v50 = vpop.f32.mrf.mxu2 }
 0x1cf   : > { %v1126_v4 = vadd.f32 %v1059_v50, %v833_v53  ;;  %v1977_v53 = vrot.slane %v4143_v12, 2 }
 0x1d0   : > { %v835_v8 = vpop.f32.mrf.mxu1 }
 0x1d1   : > { %v1536_v31 = vadd.f32 %v4991_v36, %v1126_v4  ;;  %v1887_v39 = vpop.f32.mrf.mxu0  ;;  %v836_v63 = vadd.f32 %v835_v8, %v5730_v1  ;;  %v2688_v36 = vshrl.u32 %v5069_v35, 16  ;;  %v5731_v4 = vld [vmem:[#allocation9_spill] sm:$0xff] }
 0x1d3   : > { %3841 = vmatmul.msk.bf16.vlgmr.msra.gmra.mxu1 %vm533_vm2, %v1976_v3  ;;  %3939 = vmatmul.msk.bf16.vlgmr.msra.gmra.mxu2 %vm533_vm2, %v2386_v16  ;;  %v5065_v58 = vadd.f32 %v1884_v62, %v1536_v31  ;;  %v2690_v48 = vrot.slane %v2688_v36, 2  ;;  %v5075_v44 = vpop.f32.mrf.mxu3  ;;  %v3070_v3 = vrot.slane %v5010_v47, 3  ;;  %v5097_v36 = vld [vmem:[%s4340_s11 + $0x38] sm:$0xff] }
 0x1d4   : > { %3983 = vmatmul.msk.bf16.vlgmr.msra.gmra.mxu0 %vm533_vm2, %v3069_v21  ;;  %v1978_v21 = vsel %vm1973_vm6, %v1975_v29, %v1977_v53  ;;  %v5732_v29 = vld [vmem:[#allocation11_spill] sm:$0xff] }
 0x1d5   : > { %v2694_v27 = vor.u32 %v2693_v5, %v2690_v48 }
 0x1d6   : > { %v1062_v55 = vpop.f32.mrf.mxu2 }
 0x1d7   : > { %v1127_v20 = vadd.f32 %v1062_v55, %v836_v63  ;;  %v2695_v50 = vsel %vm2651_vm5, %v2685_v60, %v2694_v27  ;;  %v3071_v55 = vsel %vm3066_vm7, %v3068_v10, %v3070_v3  ;;  %v2700_v10 = vshll.u32 %v5097_v36, 16 }
 0x1d8   : > { %v837_v28 = vpop.f32.mrf.mxu1 }
 0x1d9   : > { %v1537_v9 = vadd.f32 %v5002_v30, %v1127_v20  ;;  %v1889_v62 = vpop.f32.mrf.mxu0  ;;  %v838_v8 = vadd.f32 %v837_v28, %v5731_v4  ;;  %v2702_v5 = vrot.slane %v2700_v10, 3 }
 0x1da   : > { %3964 = vmatmul.msk.bf16.gmra.mxu3 %vm533_vm2, %v2695_v50 }
 0x1db   : > { %v5077_v46 = vadd.f32 %v1887_v39, %v1537_v9  ;;  %v2388_v39 = vsel %vm1973_vm6, %v2385_v56, %v2387_v42  ;;  %v5089_v60 = vpop.f32.mrf.mxu3 }
 0x1de   : > { %v1064_v16 = vpop.f32.mrf.mxu2 }
 0x1df   : > { %v1128_v30 = vadd.f32 %v1064_v16, %v838_v8  ;;  %v4144_v8 = vld [vmem:[%s4340_s11 + $0x20] sm:$0xff] }
 0x1e0   : > { %v840_v31 = vpop.f32.mrf.mxu1  ;;  %v1979_v16 = vrot.slane %v4144_v8, 2 }
 0x1e1   : > { %v1538_v1 = vadd.f32 %v5016_v6, %v1128_v30  ;;  %v1892_v63 = vpop.f32.mrf.mxu0  ;;  %v841_v56 = vadd.f32 %v840_v31, %v5732_v29  ;;  %v2697_v6 = vshrl.u32 %v5097_v36, 16  ;;  %v2389_v30 = vrot.slane %v5036_v49, 2 }
 0x1e3   : > { %3842 = vmatmul.msk.bf16.gmra.mxu1 %vm533_vm2, %v1978_v21  ;;  %3940 = vmatmul.msk.bf16.gmra.mxu2 %vm533_vm2, %v2388_v39  ;;  %v5093_v47 = vadd.f32 %v1889_v62, %v1538_v1  ;;  %v2699_v48 = vrot.slane %v2697_v6, 2  ;;  %v5103_v12 = vpop.f32.mrf.mxu3  ;;  %v5733_v21 = vld [vmem:[#allocation13_spill] sm:$0xff]  ;;  %v3072_v1 = vrot.slane %v5036_v49, 3 }
 0x1e4   : > { %3984 = vmatmul.msk.bf16.gmra.mxu0 %vm533_vm2, %v3071_v55 }
 0x1e5   : > { %v2703_v50 = vor.u32 %v2702_v5, %v2699_v48  ;;  %v3073_v10 = vsel %vm3066_vm7, %v3070_v3, %v3072_v1 }
 0x1e6   : > { %v1067_v38 = vpop.f32.mrf.mxu2 }
 0x1e7   : > { %v1129_v20 = vadd.f32 %v1067_v38, %v841_v56  ;;  %v2704_v31 = vsel %vm2651_vm5, %v2694_v27, %v2703_v50  ;;  %v1980_v56 = vsel %vm1973_vm6, %v1977_v53, %v1979_v16  ;;  %v5734_v53 = vld [vmem:[#allocation15_spill] sm:$0xff] }
 0x1e8   : > { %v842_v28 = vpop.f32.mrf.mxu1 }
 0x1e9   : > { %v1539_v9 = vadd.f32 %v5027_v51, %v1129_v20  ;;  %v1894_v62 = vpop.f32.mrf.mxu0  ;;  %v843_v39 = vadd.f32 %v842_v28, %v5733_v21  ;;  %v5125_v20 = vld [vmem:[%s4340_s11 + $0x40] sm:$0xff] }
 0x1ea   : > { %3965 = vmatmul.msk.bf16.gmra.mxu3 %vm533_vm2, %v2704_v31  ;;  %v2709_v3 = vshll.u32 %v5125_v20, 16 }
 0x1eb   : > { %v5105_v4 = vadd.f32 %v1892_v63, %v1539_v9  ;;  %v2390_v63 = vsel %vm1973_vm6, %v2387_v42, %v2389_v30  ;;  %v5117_v27 = vpop.f32.mrf.mxu3 }
 0x1ec   : > { %v2711_v8 = vrot.slane %v2709_v3, 3 }
 0x1ee   : > { %v1069_v55 = vpop.f32.mrf.mxu2 }
 0x1ef   : > { %v1130_v51 = vadd.f32 %v1069_v55, %v843_v39 }
 0x1f0   : > { %v845_v29 = vpop.f32.mrf.mxu1 }
 0x1f1   : > { %v1540_v38 = vadd.f32 %v5046_v34, %v1130_v51  ;;  %v1897_v6 = vpop.f32.mrf.mxu0  ;;  %v846_v42 = vadd.f32 %v845_v29, %v5734_v53  ;;  %v2706_v34 = vshrl.u32 %v5125_v20, 16  ;;  %v4145_v51 = vld [vmem:[%s4340_s11 + $0x28] sm:$0xff]  ;;  %v2391_v29 = vrot.slane %v5069_v35, 2 }
 0x1f2   : > { %v3074_v53 = vrot.slane %v5069_v35, 3 }
 0x1f3   : > { %3843 = vmatmul.msk.bf16.gmra.mxu1 %vm533_vm2, %v1980_v56  ;;  %3941 = vmatmul.msk.bf16.gmra.mxu2 %vm533_vm2, %v2390_v63  ;;  %v5121_v49 = vadd.f32 %v1894_v62, %v1540_v38  ;;  %v2708_v9 = vrot.slane %v2706_v34, 2  ;;  %v5131_v21 = vpop.f32.mrf.mxu3  ;;  %v1981_v56 = vrot.slane %v4145_v51, 2  ;;  %v5735_v38 = vld [vmem:[#allocation16_spill] sm:$0xff] }
 0x1f4   : > { %3985 = vmatmul.msk.bf16.gmra.mxu0 %vm533_vm2, %v3073_v10 }
 0x1f5   : > { %v2712_v39 = vor.u32 %v2711_v8, %v2708_v9  ;;  %v1982_v34 = vsel %vm1973_vm6, %v1979_v16, %v1981_v56  ;;  %v3075_v9 = vsel %vm3066_vm7, %v3072_v1, %v3074_v53  ;;  %v5737_v16 = vld [vmem:[#allocation17_spill] sm:$0xff] }
 0x1f6   : > { %v1072_v28 = vpop.f32.mrf.mxu2 }
 0x1f7   : > { %v1131_v48 = vadd.f32 %v1072_v28, %v846_v42  ;;  %v2713_v63 = vsel %vm2651_vm5, %v2703_v50, %v2712_v39 }
 0x1f8   : > { %v847_v5 = vpop.f32.mrf.mxu1 }
 0x1f9   : > { %v1541_v31 = vadd.f32 %v5061_v24, %v1131_v48  ;;  %v1899_v62 = vpop.f32.mrf.mxu0  ;;  %v848_v10 = vadd.f32 %v847_v5, %v5735_v38  ;;  %v5153_v5 = vld [vmem:[%s4340_s11 + $0x48] sm:$0xff] }
 0x1fa   : > { %3966 = vmatmul.msk.bf16.gmra.mxu3 %vm533_vm2, %v2713_v63  ;;  %v2718_v1 = vshll.u32 %v5153_v5, 16 }
 0x1fb   : > { %v5133_v55 = vadd.f32 %v1897_v6, %v1541_v31  ;;  %v2392_v6 = vsel %vm1973_vm6, %v2389_v30, %v2391_v29  ;;  %v5145_v50 = vpop.f32.mrf.mxu3 }
 0x1fc   : > { %v2720_v38 = vrot.slane %v2718_v1, 3 }
 0x1fe   : > { %v1074_v42 = vpop.f32.mrf.mxu2 }
 0x1ff   : > { %v1132_v24 = vadd.f32 %v1074_v42, %v848_v10 }
 0x200   : > { %v850_v28 = vpop.f32.mrf.mxu1 }
 0x201   : > { %v1542_v3 = vadd.f32 %v5075_v44, %v1132_v24  ;;  %v1902_v48 = vpop.f32.mrf.mxu0  ;;  %v851_v30 = vadd.f32 %v850_v28, %v5737_v16  ;;  %v2715_v44 = vshrl.u32 %v5153_v5, 16  ;;  %v2393_v28 = vrot.slane %v5097_v36, 2  ;;  %v5739_v16 = vld [vmem:[#allocation18_spill] sm:$0xff] }
 0x203   : > { %3844 = vmatmul.msk.bf16.gmra.mxu1 %vm533_vm2, %v1982_v34  ;;  %3942 = vmatmul.msk.bf16.gmra.mxu2 %vm533_vm2, %v2392_v6  ;;  %v5149_v35 = vadd.f32 %v1899_v62, %v1542_v3  ;;  %v2717_v63 = vrot.slane %v2715_v44, 2  ;;  %v5159_v42 = vpop.f32.mrf.mxu3  ;;  %v4146_v6 = vld [vmem:[%s4340_s11 + $0x30] sm:$0xff] }
 0x204   : > { %3986 = vmatmul.msk.bf16.gmra.mxu0 %vm533_vm2, %v3075_v9  ;;  %v1983_v3 = vrot.slane %v4146_v6, 2 }
 0x205   : > { %5736 = vst [vmem:[#allocation5_spill] sm:$0xff] %v5149_v35  ;;  %v2721_v24 = vor.u32 %v2720_v38, %v2717_v63 }
 0x206   : > { %v1077_v8 = vpop.f32.mrf.mxu2  ;;  %v1984_v1 = vsel %vm1973_vm6, %v1981_v56, %v1983_v3  ;;  %v5741_v56 = vld [vmem:[#allocation19_spill] sm:$0xff] }
 0x207   : > { %v1133_v31 = vadd.f32 %v1077_v8, %v851_v30  ;;  %v2722_v9 = vsel %vm2651_vm5, %v2712_v39, %v2721_v24  ;;  %v3076_v30 = vrot.slane %v5097_v36, 3 }
 0x208   : > { %v852_v51 = vpop.f32.mrf.mxu1 }
 0x209   : > { %v1543_v10 = vadd.f32 %v5089_v60, %v1133_v31  ;;  %v1904_v62 = vpop.f32.mrf.mxu0  ;;  %v853_v35 = vadd.f32 %v852_v51, %v5739_v16  ;;  %v3077_v38 = vsel %vm3066_vm7, %v3074_v53, %v3076_v30 }
 0x20a   : > { %3967 = vmatmul.msk.bf16.gmra.mxu3 %vm533_vm2, %v2722_v9 }
 0x20b   : > { %v5161_v34 = vadd.f32 %v1902_v48, %v1543_v10  ;;  %v2394_v48 = vsel %vm1973_vm6, %v2391_v29, %v2393_v28  ;;  %v5173_v39 = vpop.f32.mrf.mxu3 }
 0x20d   : > { %5738 = vst [vmem:[#allocation7_spill] sm:$0xff] %v5161_v34 }
 0x20e   : > { %v1079_v8 = vpop.f32.mrf.mxu2 }
 0x20f   : > { %v1134_v60 = vadd.f32 %v1079_v8, %v853_v35  ;;  %v5181_v35 = vld [vmem:[%s4340_s11 + $0x50] sm:$0xff] }
 0x210   : > { %v855_v44 = vpop.f32.mrf.mxu1  ;;  %v2727_v53 = vshll.u32 %v5181_v35, 16 }
 0x211   : > { %v1544_v31 = vadd.f32 %v5103_v12, %v1134_v60  ;;  %v1907_v63 = vpop.f32.mrf.mxu0  ;;  %v856_v29 = vadd.f32 %v855_v44, %v5741_v56  ;;  %v2724_v12 = vshrl.u32 %v5181_v35, 16  ;;  %v2395_v44 = vrot.slane %v5125_v20, 2 }
 0x212   : > { %v2729_v16 = vrot.slane %v2727_v53, 3 }
 0x213   : > { %3845 = vmatmul.msk.bf16.gmra.mxu1 %vm533_vm2, %v1984_v1  ;;  %3943 = vmatmul.msk.bf16.gmra.mxu2 %vm533_vm2, %v2394_v48  ;;  %v5177_v36 = vadd.f32 %v1904_v62, %v1544_v31  ;;  %v2726_v9 = vrot.slane %v2724_v12, 2  ;;  %v5187_v60 = vpop.f32.mrf.mxu3  ;;  %v4147_v31 = vld [vmem:[%s4340_s11 + $0x38] sm:$0xff] }
 0x214   : > { %3987 = vmatmul.msk.bf16.gmra.mxu0 %vm533_vm2, %v3077_v38  ;;  %v1985_v38 = vrot.slane %v4147_v31, 2 }
 0x215   : > { %5740 = vst [vmem:[#allocation9_spill] sm:$0xff] %v5177_v36  ;;  %v2730_v1 = vor.u32 %v2729_v16, %v2726_v9  ;;  %v5743_v36 = vld [vmem:[#allocation20_spill] sm:$0xff] }
 0x216   : > { %v1082_v51 = vpop.f32.mrf.mxu2  ;;  %v1986_v53 = vsel %vm1973_vm6, %v1983_v3, %v1985_v38  ;;  %v5745_v3 = vld [vmem:[#allocation6_spill] sm:$0xff] }
 0x217   : > { %v1135_v10 = vadd.f32 %v1082_v51, %v856_v29  ;;  %v2731_v56 = vsel %vm2651_vm5, %v2721_v24, %v2730_v1  ;;  %v3078_v29 = vrot.slane %v5125_v20, 3 }
 0x218   : > { %v857_v6 = vpop.f32.mrf.mxu1 }
 0x219   : > { %v1545_v8 = vadd.f32 %v5117_v27, %v1135_v10  ;;  %v1909_v62 = vpop.f32.mrf.mxu0  ;;  %v858_v34 = vadd.f32 %v857_v6, %v5743_v36  ;;  %v3079_v16 = vsel %vm3066_vm7, %v3076_v30, %v3078_v29 }
 0x21a   : > { %3968 = vmatmul.msk.bf16.gmra.mxu3 %vm533_vm2, %v2731_v56 }
 0x21b   : > { %v5189_v48 = vadd.f32 %v1907_v63, %v1545_v8  ;;  %v2396_v63 = vsel %vm1973_vm6, %v2393_v28, %v2395_v44  ;;  %v5201_v24 = vpop.f32.mrf.mxu3 }
 0x21d   : > { %5742 = vst [vmem:[#allocation11_spill] sm:$0xff] %v5189_v48 }
 0x21e   : > { %v1084_v51 = vpop.f32.mrf.mxu2 }
 0x21f   : > { %v1136_v27 = vadd.f32 %v1084_v51, %v858_v34  ;;  %v5209_v34 = vld [vmem:[%s4340_s11 + $0x58] sm:$0xff] }
 0x220   : > { %v860_v12 = vpop.f32.mrf.mxu1  ;;  %v2736_v30 = vshll.u32 %v5209_v34, 16 }
 0x221   : > { %v1546_v10 = vadd.f32 %v5131_v21, %v1136_v27  ;;  %v1912_v9 = vpop.f32.mrf.mxu0  ;;  %v861_v28 = vadd.f32 %v860_v12, %v5745_v3  ;;  %v2733_v21 = vshrl.u32 %v5209_v34, 16  ;;  %v2397_v12 = vrot.slane %v5153_v5, 2 }
 0x222   : > { %v2738_v56 = vrot.slane %v2736_v30, 3 }
 0x223   : > { %3846 = vmatmul.msk.bf16.gmra.mxu1 %vm533_vm2, %v1986_v53  ;;  %3944 = vmatmul.msk.bf16.gmra.mxu2 %vm533_vm2, %v2396_v63  ;;  %v5205_v20 = vadd.f32 %v1909_v62, %v1546_v10  ;;  %v2735_v31 = vrot.slane %v2733_v21, 2  ;;  %v1509_v27 = vpop.f32.mrf.mxu3  ;;  %v4148_v10 = vld [vmem:[%s4340_s11 + $0x40] sm:$0xff] }
 0x224   : > { %3988 = vmatmul.msk.bf16.gmra.mxu0 %vm533_vm2, %v3079_v16  ;;  %v1987_v16 = vrot.slane %v4148_v10, 2 }
 0x225   : > { %5744 = vst [vmem:[#allocation13_spill] sm:$0xff] %v5205_v20  ;;  %v2739_v53 = vor.u32 %v2738_v56, %v2735_v31  ;;  %v5746_v20 = vld [vmem:[#allocation8_spill] sm:$0xff] }
 0x226   : > { %v1087_v36 = vpop.f32.mrf.mxu2  ;;  %v1988_v30 = vsel %vm1973_vm6, %v1985_v38, %v1987_v16  ;;  %v5748_v38 = vld [vmem:[#allocation10_spill] sm:$0xff] }
 0x227   : > { %v1137_v6 = vadd.f32 %v1087_v36, %v861_v28  ;;  %v2740_v3 = vsel %vm2651_vm5, %v2730_v1, %v2739_v53  ;;  %v3080_v28 = vrot.slane %v5153_v5, 3 }
 0x228   : > { %v862_v8 = vpop.f32.mrf.mxu1 }
 0x229   : > { %v1547_v51 = vadd.f32 %v5145_v50, %v1137_v6  ;;  %v1914_v62 = vpop.f32.mrf.mxu0  ;;  %v863_v48 = vadd.f32 %v862_v8, %v5746_v20  ;;  %v3081_v56 = vsel %vm3066_vm7, %v3078_v29, %v3080_v28 }
 0x22a   : > { %3969 = vmatmul.msk.bf16.gmra.mxu3 %vm533_vm2, %v2740_v3 }
 0x22b   : > { %v5215_v63 = vadd.f32 %v1912_v9, %v1547_v51  ;;  %v2398_v9 = vsel %vm1973_vm6, %v2395_v44, %v2397_v12 }
 0x22d   : > { %v5227_v1 = vpop.f32.mrf.mxu3 }
 0x22e   : > { %v1089_v36 = vpop.f32.mrf.mxu2 }
 0x22f   : > { %v1138_v50 = vadd.f32 %v1089_v36, %v863_v48  ;;  %v5235_v48 = vld [vmem:[%s4340_s11 + $0x60] sm:$0xff] }
 0x230   : > { %v865_v21 = vpop.f32.mrf.mxu1  ;;  %v2745_v29 = vshll.u32 %v5235_v48, 16 }
 0x231   : > { %v1548_v6 = vadd.f32 %v5159_v42, %v1138_v50  ;;  %v1917_v31 = vpop.f32.mrf.mxu0  ;;  %v866_v44 = vadd.f32 %v865_v21, %v5748_v38  ;;  %v2742_v42 = vshrl.u32 %v5235_v48, 16  ;;  %v2399_v21 = vrot.slane %v5181_v35, 2  ;;  %v5749_v38 = vld [vmem:[#allocation12_spill] sm:$0xff] }
 0x232   : > { %v2747_v10 = vrot.slane %v2745_v29, 3 }
 0x233   : > { %3847 = vmatmul.msk.bf16.gmra.mxu1 %vm533_vm2, %v1988_v30  ;;  %3945 = vmatmul.msk.bf16.gmra.mxu2 %vm533_vm2, %v2398_v9  ;;  %v5231_v5 = vadd.f32 %v1914_v62, %v1548_v6  ;;  %v2744_v27 = vrot.slane %v2742_v42, 2  ;;  %v4149_v9 = vld [vmem:[%s4340_s11 + $0x48] sm:$0xff] }
 0x234   : > { %3989 = vmatmul.msk.bf16.gmra.mxu0 %vm533_vm2, %v3081_v56  ;;  %v1989_v6 = vrot.slane %v4149_v9, 2 }
 0x235   : > { %5747 = vst [vmem:[#allocation15_spill] sm:$0xff] %v5231_v5  ;;  %v5241_v36 = vpop.f32.mrf.mxu3  ;;  %v2748_v50 = vor.u32 %v2747_v10, %v2744_v27 }
 0x236   : > { %v1092_v20 = vpop.f32.mrf.mxu2  ;;  %v1990_v29 = vsel %vm1973_vm6, %v1987_v16, %v1989_v6  ;;  %v5751_v16 = vld [vmem:[#allocation14_spill] sm:$0xff] }
 0x237   : > { %v1139_v8 = vadd.f32 %v1092_v20, %v866_v44  ;;  %v2749_v56 = vsel %vm2651_vm5, %v2739_v53, %v2748_v50  ;;  %v3082_v44 = vrot.slane %v5181_v35, 3 }
 0x238   : > { %v867_v51 = vpop.f32.mrf.mxu1 }
 0x239   : > { %v1549_v3 = vadd.f32 %v5173_v39, %v1139_v8  ;;  %v1919_v62 = vpop.f32.mrf.mxu0  ;;  %v868_v5 = vadd.f32 %v867_v51, %v5749_v38  ;;  %v3083_v10 = vsel %vm3066_vm7, %v3080_v28, %v3082_v44 }
 0x23a   : > { %3970 = vmatmul.msk.bf16.gmra.mxu3 %vm533_vm2, %v2749_v56 }
 0x23b   : > { %v5243_v30 = vadd.f32 %v1917_v31, %v1549_v3  ;;  %v2400_v31 = vsel %vm1973_vm6, %v2397_v12, %v2399_v21 }
 0x23d   : > { %v5255_v53 = vpop.f32.mrf.mxu3 }
 0x23e   : > { %v1094_v20 = vpop.f32.mrf.mxu2 }
 0x23f   : > { %v1140_v39 = vadd.f32 %v1094_v20, %v868_v5  ;;  %v5263_v5 = vld [vmem:[%s4340_s11 + $0x68] sm:$0xff] }
 0x240   : > { %v870_v42 = vpop.f32.mrf.mxu1  ;;  %v2754_v28 = vshll.u32 %v5263_v5, 16 }
 0x241   : > { %v1550_v8 = vadd.f32 %v5187_v60, %v1140_v39  ;;  %v1922_v27 = vpop.f32.mrf.mxu0  ;;  %v871_v12 = vadd.f32 %v870_v42, %v5751_v16  ;;  %v2751_v60 = vshrl.u32 %v5263_v5, 16 }
 0x242   : > { %v2756_v38 = vrot.slane %v2754_v28, 3 }
 0x243   : > { %3848 = vmatmul.msk.bf16.gmra.mxu1 %vm533_vm2, %v1990_v29  ;;  %3946 = vmatmul.msk.bf16.gmra.mxu2 %vm533_vm2, %v2400_v31  ;;  %v5259_v35 = vadd.f32 %v1919_v62, %v1550_v8  ;;  %v2753_v56 = vrot.slane %v2751_v60, 2  ;;  %v4150_v8 = vld [vmem:[%s4340_s11 + $0x50] sm:$0xff] }
 0x244   : > { %3990 = vmatmul.msk.bf16.gmra.mxu0 %vm533_vm2, %v3083_v10  ;;  %v1991_v42 = vrot.slane %v4150_v8, 2  ;;  %v2401_v10 = vrot.slane %v5209_v34, 2 }
 0x245   : > { %5750 = vst [vmem:[#allocation16_spill] sm:$0xff] %v5259_v35  ;;  %v5269_v39 = vpop.f32.mrf.mxu3  ;;  %v2757_v29 = vor.u32 %v2756_v38, %v2753_v56 }
 0x246   : > { %v1097_v51 = vpop.f32.mrf.mxu2  ;;  %v1992_v60 = vsel %vm1973_vm6, %v1989_v6, %v1991_v42  ;;  %v2402_v28 = vsel %vm1973_vm6, %v2399_v21, %v2401_v10 }
 0x247   : > { %v1141_v3 = vadd.f32 %v1097_v51, %v871_v12  ;;  %v2758_v16 = vsel %vm2651_vm5, %v2748_v50, %v2757_v29  ;;  %v3084_v12 = vrot.slane %v5209_v34, 3  ;;  %v5287_v34 = vld [vmem:[%s4340_s11 + $0x70] sm:$0xff] }
 0x248   : > { %v872_v9 = vpop.f32.mrf.mxu1  ;;  %v2760_v21 = vshrl.u32 %v5287_v34, 16  ;;  %v2763_v56 = vshll.u32 %v5287_v34, 16 }
 0x249   : > { %v1551_v20 = vadd.f32 %v5201_v24, %v1141_v3  ;;  %v1924_v62 = vpop.f32.mrf.mxu0  ;;  %v3085_v3 = vsel %vm3066_vm7, %v3082_v44, %v3084_v12 }
 0x24a   : > { %3971 = vmatmul.msk.bf16.gmra.mxu3 %vm533_vm2, %v2758_v16  ;;  %v2765_v62 = vrot.slane %v2763_v56, 3  ;;  %v5297_v16 = vld [vmem:[%s5707_s2] ss:$0 sm:$0xff]  ;;  %v3086_v56 = vrot.slane %v5235_v48, 3 }
 0x24b   : > { %v5271_v31 = vadd.f32 %v1922_v27, %v1551_v20  ;;  %v2762_v20 = vrot.slane %v2760_v21, 2 }
 0x24d   : > { %5752 = vst [vmem:[#allocation17_spill] sm:$0xff] %v5271_v31  ;;  %v5281_v9 = vpop.f32.mrf.mxu3 }
 0x24e   : > { %v1099_v51 = vpop.f32.mrf.mxu2 }
 0x250   : > { %v2090_v24 = vpop.f32.mrf.mxu1 }
 0x251   : > { %v3183_v27 = vpop.f32.mrf.mxu0  ;;  %v2194_v50 = vadd.f32 %v2090_v24, %v4719_v54  ;;  %v2766_v24 = vor.u32 %v2765_v62, %v2762_v20 }
 0x253   : > { %3849 = vmatmul.msk.bf16.gmra.mxu1 %vm533_vm2, %v1992_v60  ;;  %3947 = vmatmul.msk.bf16.gmra.mxu2 %vm533_vm2, %v2402_v28  ;;  %v4151_v28 = vld [vmem:[%s4340_s11 + $0x58] sm:$0xff] }
 0x254   : > { %3991 = vmatmul.msk.bf16.gmra.mxu0 %vm533_vm2, %v3085_v3  ;;  %v1993_v3 = vrot.slane %v4151_v28, 2 }
 0x255   : > { %v5299_v54 = vpop.f32.mrf.mxu3 }
 0x256   : > { %v2500_v6 = vpop.f32.mrf.mxu2 }
 0x257   : > { %v2604_v44 = vadd.f32 %v2500_v6, %v2194_v50  ;;  %v2403_v50 = vrot.slane %v5235_v48, 2  ;;  %v2767_v6 = vsel %vm2651_vm5, %v2757_v29, %v2766_v24  ;;  %v3087_v48 = vsel %vm3066_vm7, %v3084_v12, %v3086_v56 }
 0x258   : > { %v2092_v38 = vpop.f32.mrf.mxu1 }
 0x259   : > { %v3019_v8 = vadd.f32 %v5227_v1, %v2604_v44  ;;  %v3185_v51 = vpop.f32.mrf.mxu0  ;;  %v2195_v21 = vadd.f32 %v2092_v38, %v4732_v15  ;;  %v2404_v62 = vsel %vm1973_vm6, %v2401_v10, %v2403_v50 }
 0x25a   : > { %3972 = vmatmul.msk.bf16.gmra.mxu3 %vm533_vm2, %v2767_v6 }
 0x25b   : > { %v3287_v60 = vadd.f32 %v3183_v27, %v3019_v8  ;;  %v1994_v27 = vsel %vm1973_vm6, %v1991_v42, %v1993_v3  ;;  %v5323_v42 = vld [vmem:[%s4340_s11 + $0x78] sm:$0xff] }
 0x25c   : > { %v2772_v12 = vshll.u32 %v5323_v42, 16 }
 0x25d   : > { %v3332_v1 = vadd.f32 %v5297_v16, %v3287_v60  ;;  %v5317_v38 = vpop.f32.mrf.mxu3 }
 0x25e   : > { %v2502_v44 = vpop.f32.mrf.mxu2 }
 0x25f   : > { %v3373_v31 = vmax.f32 %v3332_v1, 0.0  ;;  %v2605_v35 = vadd.f32 %v2502_v44, %v2195_v21  ;;  %v2774_v1 = vrot.slane %v2772_v12, 3 }
 0x260   : > { %v2095_v20 = vpop.f32.mrf.mxu1 }
 0x261   : > { %3414 = vst [vmem:[%s5312_s9] sm:$0xff] %v3373_v31  ;;  %v3020_v29 = vadd.f32 %v5241_v36, %v2605_v35  ;;  %v3188_v15 = vpop.f32.mrf.mxu0  ;;  %v2196_v36 = vadd.f32 %v2095_v20, %v4743_v25  ;;  %v2769_v31 = vshrl.u32 %v5323_v42, 16  ;;  %v4152_v25 = vld [vmem:[%s4340_s11 + $0x60] sm:$0xff] }
 0x262   : > { %v1995_v20 = vrot.slane %v4152_v25, 2 }
 0x263   : > { %v3288_v8 = vadd.f32 %v3185_v51, %v3020_v29  ;;  %3850 = vmatmul.msk.bf16.gmra.mxu1 %vm533_vm2, %v1994_v27  ;;  %3948 = vmatmul.msk.bf16.gmra.mxu2 %vm533_vm2, %v2404_v62  ;;  %v2771_v6 = vrot.slane %v2769_v31, 2 }
 0x264   : > { %3992 = vmatmul.msk.bf16.gmra.mxu0 %vm533_vm2, %v3087_v48  ;;  %v2405_v48 = vrot.slane %v5263_v5, 2 }
 0x265   : > { %v3333_v10 = vadd.f32 %v5297_v16, %v3288_v8  ;;  %v5331_v27 = vpop.f32.mrf.mxu3  ;;  %v2775_v62 = vor.u32 %v2774_v1, %v2771_v6 }
 0x266   : > { %v2505_v35 = vpop.f32.mrf.mxu2 }
 0x267   : > { %v3374_v60 = vmax.f32 %v3333_v10, 0.0  ;;  %v2606_v51 = vadd.f32 %v2505_v35, %v2196_v36  ;;  %v2776_v8 = vsel %vm2651_vm5, %v2766_v24, %v2775_v62  ;;  %v3088_v35 = vrot.slane %v5263_v5, 3 }
 0x268   : > { %v2097_v28 = vpop.f32.mrf.mxu1 }
 0x269   : > { %3415 = vst [vmem:[%s5312_s9 + $0x8] sm:$0xff] %v3374_v60  ;;  %v3021_v21 = vadd.f32 %v5255_v53, %v2606_v51  ;;  %v3190_v44 = vpop.f32.mrf.mxu0  ;;  %v2197_v36 = vadd.f32 %v2097_v28, %v4757_v37  ;;  %v2406_v51 = vsel %vm1973_vm6, %v2403_v50, %v2405_v48  ;;  %v3089_v1 = vsel %vm3066_vm7, %v3086_v56, %v3088_v35  ;;  %v5351_v28 = vld [vmem:[%s4340_s11 + $0x80] sm:$0xff] }
 0x26a   : > { %3973 = vmatmul.msk.bf16.gmra.mxu3 %vm533_vm2, %v2776_v8  ;;  %v2778_v56 = vshrl.u32 %v5351_v28, 16 }
 0x26b   : > { %v3289_v29 = vadd.f32 %v3188_v15, %v3021_v21  ;;  %v1996_v15 = vsel %vm1973_vm6, %v1993_v3, %v1995_v20  ;;  %v2781_v21 = vshll.u32 %v5351_v28, 16 }
 0x26c   : > { %v2780_v8 = vrot.slane %v2778_v56, 2 }
 0x26d   : > { %v3334_v10 = vadd.f32 %v5297_v16, %v3289_v29  ;;  %v5345_v37 = vpop.f32.mrf.mxu3 }
 0x26e   : > { %v2507_v31 = vpop.f32.mrf.mxu2 }
 0x26f   : > { %v3375_v53 = vmax.f32 %v3334_v10, 0.0  ;;  %v2607_v12 = vadd.f32 %v2507_v31, %v2197_v36  ;;  %v2783_v10 = vrot.slane %v2781_v21, 3 }
 0x270   : > { %v2100_v60 = vpop.f32.mrf.mxu1 }
 0x271   : > { %3416 = vst [vmem:[%s5312_s9 + $0x10] sm:$0xff] %v3375_v53  ;;  %v3022_v24 = vadd.f32 %v5269_v39, %v2607_v12  ;;  %v3193_v6 = vpop.f32.mrf.mxu0  ;;  %v2198_v39 = vadd.f32 %v2100_v60, %v4770_v32  ;;  %v2784_v12 = vor.u32 %v2783_v10, %v2780_v8  ;;  %v4153_v32 = vld [vmem:[%s4340_s11 + $0x68] sm:$0xff] }
 0x272   : > { %v1997_v60 = vrot.slane %v4153_v32, 2 }
 0x273   : > { %v3290_v5 = vadd.f32 %v3190_v44, %v3022_v24  ;;  %3851 = vmatmul.msk.bf16.gmra.mxu1 %vm533_vm2, %v1996_v15  ;;  %3949 = vmatmul.msk.bf16.gmra.mxu2 %vm533_vm2, %v2406_v51  ;;  %v2407_v51 = vrot.slane %v5287_v34, 2  ;;  %v2785_v24 = vsel %vm2651_vm5, %v2775_v62, %v2784_v12 }
 0x274   : > { %3993 = vmatmul.msk.bf16.gmra.mxu0 %vm533_vm2, %v3089_v1 }
 0x275   : > { %v3335_v3 = vadd.f32 %v5297_v16, %v3290_v5  ;;  %v5359_v53 = vpop.f32.mrf.mxu3  ;;  %v2408_v21 = vsel %vm1973_vm6, %v2405_v48, %v2407_v51 }
 0x276   : > { %v2510_v50 = vpop.f32.mrf.mxu2 }
 0x277   : > { %v3376_v29 = vmax.f32 %v3335_v3, 0.0  ;;  %v2608_v44 = vadd.f32 %v2510_v50, %v2198_v39  ;;  %v3090_v3 = vrot.slane %v5287_v34, 3 }
 0x278   : > { %v2102_v25 = vpop.f32.mrf.mxu1 }
 0x279   : > { %3417 = vst [vmem:[%s5312_s9 + $0x18] sm:$0xff] %v3376_v29  ;;  %v3023_v36 = vadd.f32 %v5281_v9, %v2608_v44  ;;  %v3195_v31 = vpop.f32.mrf.mxu0  ;;  %v2199_v5 = vadd.f32 %v2102_v25, %v4784_v13  ;;  %v3091_v44 = vsel %vm3066_vm7, %v3088_v35, %v3090_v3  ;;  %v5379_v25 = vld [vmem:[%s4340_s11 + $0x88] sm:$0xff] }
 0x27a   : > { %3974 = vmatmul.msk.bf16.gmra.mxu3 %vm533_vm2, %v2785_v24  ;;  %v2787_v35 = vshrl.u32 %v5379_v25, 16  ;;  %v2790_v8 = vshll.u32 %v5379_v25, 16 }
 0x27b   : > { %v3291_v15 = vadd.f32 %v3193_v6, %v3023_v36  ;;  %v1998_v6 = vsel %vm1973_vm6, %v1995_v20, %v1997_v60 }
 0x27c   : > { %v2792_v32 = vrot.slane %v2790_v8, 3 }
 0x27d   : > { %v3336_v1 = vadd.f32 %v5297_v16, %v3291_v15  ;;  %v5373_v13 = vpop.f32.mrf.mxu3  ;;  %v2789_v15 = vrot.slane %v2787_v35, 2 }
 0x27e   : > { %v2512_v39 = vpop.f32.mrf.mxu2 }
 0x27f   : > { %v3377_v9 = vmax.f32 %v3336_v1, 0.0  ;;  %v2609_v50 = vadd.f32 %v2512_v39, %v2199_v5  ;;  %v2793_v39 = vor.u32 %v2792_v32, %v2789_v15 }
 0x280   : > { %v2105_v56 = vpop.f32.mrf.mxu1 }
 0x281   : > { %3418 = vst [vmem:[%s5312_s9 + $0x20] sm:$0xff] %v3377_v9  ;;  %v3024_v62 = vadd.f32 %v5299_v54, %v2609_v50  ;;  %v3198_v29 = vpop.f32.mrf.mxu0  ;;  %v2200_v54 = vadd.f32 %v2105_v56, %v4797_v19  ;;  %v4154_v19 = vld [vmem:[%s4340_s11 + $0x70] sm:$0xff]  ;;  %v2409_v56 = vrot.slane %v5323_v42, 2 }
 0x282   : > { %v1999_v50 = vrot.slane %v4154_v19, 2 }
 0x283   : > { %v3292_v34 = vadd.f32 %v3195_v31, %v3024_v62  ;;  %3852 = vmatmul.msk.bf16.gmra.mxu1 %vm533_vm2, %v1998_v6  ;;  %3950 = vmatmul.msk.bf16.gmra.mxu2 %vm533_vm2, %v2408_v21  ;;  %v2794_v6 = vsel %vm2651_vm5, %v2784_v12, %v2793_v39 }
 0x284   : > { %3994 = vmatmul.msk.bf16.gmra.mxu0 %vm533_vm2, %v3091_v44  ;;  %v3092_v44 = vrot.slane %v5323_v42, 3 }
 0x285   : > { %v3337_v20 = vadd.f32 %v5297_v16, %v3292_v34  ;;  %v5387_v5 = vpop.f32.mrf.mxu3 }
 0x286   : > { %v2515_v48 = vpop.f32.mrf.mxu2  ;;  %v3093_v8 = vsel %vm3066_vm7, %v3090_v3, %v3092_v44 }
 0x287   : > { %v3378_v10 = vmax.f32 %v3337_v20, 0.0  ;;  %v2610_v36 = vadd.f32 %v2515_v48, %v2200_v54  ;;  %v2410_v48 = vsel %vm1973_vm6, %v2407_v51, %v2409_v56 }
 0x288   : > { %v2107_v31 = vpop.f32.mrf.mxu1 }
 0x289   : > { %3419 = vst [vmem:[%s5312_s9 + $0x28] sm:$0xff] %v3378_v10  ;;  %v3025_v24 = vadd.f32 %v5317_v38, %v2610_v36  ;;  %v3200_v1 = vpop.f32.mrf.mxu0  ;;  %v2201_v62 = vadd.f32 %v2107_v31, %v4811_v11  ;;  %v5407_v10 = vld [vmem:[%s4340_s11 + $0x90] sm:$0xff] }
 0x28a   : > { %3975 = vmatmul.msk.bf16.gmra.mxu3 %vm533_vm2, %v2794_v6  ;;  %v2796_v3 = vshrl.u32 %v5407_v10, 16  ;;  %v2799_v36 = vshll.u32 %v5407_v10, 16 }
 0x28b   : > { %v3293_v9 = vadd.f32 %v3198_v29, %v3025_v24  ;;  %v2000_v29 = vsel %vm1973_vm6, %v1997_v60, %v1999_v50 }
 0x28c   : > { %v2798_v24 = vrot.slane %v2796_v3, 2  ;;  %v5435_v3 = vld [vmem:[%s4340_s11 + $0x98] sm:$0xff] }
 0x28d   : > { %v3338_v21 = vadd.f32 %v5297_v16, %v3293_v9  ;;  %v5401_v11 = vpop.f32.mrf.mxu3 }
 0x28e   : > { %v2517_v34 = vpop.f32.mrf.mxu2 }
 0x28f   : > { %v3379_v38 = vmax.f32 %v3338_v21, 0.0  ;;  %v2611_v20 = vadd.f32 %v2517_v34, %v2201_v62 }
 0x290   : > { %v2110_v54 = vpop.f32.mrf.mxu1 }
 0x291   : > { %3420 = vst [vmem:[%s5312_s9 + $0x30] sm:$0xff] %v3379_v38  ;;  %v3026_v12 = vadd.f32 %v5331_v27, %v2611_v20  ;;  %v3203_v35 = vpop.f32.mrf.mxu0  ;;  %v2202_v27 = vadd.f32 %v2110_v54, %v4824_v17  ;;  %v4155_v17 = vld [vmem:[%s4340_s11 + $0x78] sm:$0xff]  ;;  %v2411_v38 = vrot.slane %v5351_v28, 2 }
 0x292   : > { %v2001_v34 = vrot.slane %v4155_v17, 2 }
 0x293   : > { %v3294_v42 = vadd.f32 %v3200_v1, %v3026_v12  ;;  %3853 = vmatmul.msk.bf16.gmra.mxu1 %vm533_vm2, %v2000_v29  ;;  %3951 = vmatmul.msk.bf16.gmra.mxu2 %vm533_vm2, %v2410_v48  ;;  %v2801_v1 = vrot.slane %v2799_v36, 3  ;;  %v3094_v48 = vrot.slane %v5351_v28, 3  ;;  %v2808_v36 = vshll.u32 %v5435_v3, 16 }
 0x294   : > { %3995 = vmatmul.msk.bf16.gmra.mxu0 %vm533_vm2, %v3093_v8 }
 0x295   : > { %v3339_v60 = vadd.f32 %v5297_v16, %v3294_v42  ;;  %v5415_v6 = vpop.f32.mrf.mxu3  ;;  %v2802_v21 = vor.u32 %v2801_v1, %v2798_v24  ;;  %v2810_v1 = vrot.slane %v2808_v36, 3 }
 0x296   : > { %v2520_v51 = vpop.f32.mrf.mxu2 }
 0x297   : > { %v3380_v31 = vmax.f32 %v3339_v60, 0.0  ;;  %v2612_v15 = vadd.f32 %v2520_v51, %v2202_v27  ;;  %v2803_v20 = vsel %vm2651_vm5, %v2793_v39, %v2802_v21  ;;  %v2412_v60 = vsel %vm1973_vm6, %v2409_v56, %v2411_v38 }
 0x298   : > { %v2112_v32 = vpop.f32.mrf.mxu1  ;;  %v3095_v51 = vsel %vm3066_vm7, %v3092_v44, %v3094_v48  ;;  %v2805_v44 = vshrl.u32 %v5435_v3, 16 }
 0x299   : > { %3421 = vst [vmem:[%s5312_s9 + $0x38] sm:$0xff] %v3380_v31  ;;  %v3027_v9 = vadd.f32 %v5345_v37, %v2612_v15  ;;  %v3205_v19 = vpop.f32.mrf.mxu0  ;;  %v2203_v29 = vadd.f32 %v2112_v32, %v4838_v45 }
 0x29a   : > { %3976 = vmatmul.msk.bf16.gmra.mxu3 %vm533_vm2, %v2803_v20  ;;  %v2807_v24 = vrot.slane %v2805_v44, 2 }
 0x29b   : > { %v3295_v62 = vadd.f32 %v3203_v35, %v3027_v9  ;;  %v2002_v35 = vsel %vm1973_vm6, %v1999_v50, %v2001_v34 }
 0x29c   : > { %v2811_v17 = vor.u32 %v2810_v1, %v2807_v24 }
 0x29d   : > { %v3340_v54 = vadd.f32 %v5297_v16, %v3295_v62  ;;  %v5429_v45 = vpop.f32.mrf.mxu3 }
 0x29e   : > { %v2522_v12 = vpop.f32.mrf.mxu2 }
 0x29f   : > { %v3381_v37 = vmax.f32 %v3340_v54, 0.0  ;;  %v2613_v8 = vadd.f32 %v2522_v12, %v2203_v29  ;;  %v2413_v29 = vrot.slane %v5379_v25, 2  ;;  %v2812_v12 = vsel %vm2651_vm5, %v2802_v21, %v2811_v17 }
 0x2a0   : > { %v2115_v42 = vpop.f32.mrf.mxu1 }
 0x2a1   : > { %3422 = vst [vmem:[%s5312_s9 + $0x40] sm:$0xff] %v3381_v37  ;;  %v3028_v39 = vadd.f32 %v5359_v53, %v2613_v8  ;;  %v3208_v27 = vpop.f32.mrf.mxu0  ;;  %v2204_v53 = vadd.f32 %v2115_v42, %v4851_v43  ;;  %v4156_v43 = vld [vmem:[%s4340_s11 + $0x80] sm:$0xff]  ;;  %v3096_v42 = vrot.slane %v5379_v25, 3 }
 0x2a2   : > { %v2003_v54 = vrot.slane %v4156_v43, 2 }
 0x2a3   : > { %v3296_v28 = vadd.f32 %v3205_v19, %v3028_v39  ;;  %3854 = vmatmul.msk.bf16.gmra.mxu1 %vm533_vm2, %v2002_v35  ;;  %3952 = vmatmul.msk.bf16.gmra.mxu2 %vm533_vm2, %v2412_v60 }
 0x2a4   : > { %3996 = vmatmul.msk.bf16.gmra.mxu0 %vm533_vm2, %v3095_v51  ;;  %v2414_v51 = vsel %vm1973_vm6, %v2411_v38, %v2413_v29 }
 0x2a5   : > { %v3341_v50 = vadd.f32 %v5297_v16, %v3296_v28  ;;  %v5443_v62 = vpop.f32.mrf.mxu3 }
 0x2a6   : > { %v2525_v56 = vpop.f32.mrf.mxu2 }
 0x2a7   : > { %v3382_v31 = vmax.f32 %v3341_v50, 0.0  ;;  %v2614_v15 = vadd.f32 %v2525_v56, %v2204_v53  ;;  %v3097_v50 = vsel %vm3066_vm7, %v3094_v48, %v3096_v42  ;;  %v5463_v53 = vld [vmem:[%s4340_s11 + $0xa0] sm:$0xff] }
 0x2a8   : > { %v2117_v32 = vpop.f32.mrf.mxu1  ;;  %v2814_v48 = vshrl.u32 %v5463_v53, 16  ;;  %v2817_v56 = vshll.u32 %v5463_v53, 16 }
 0x2a9   : > { %3423 = vst [vmem:[%s5312_s9 + $0x48] sm:$0xff] %v3382_v31  ;;  %v3029_v9 = vadd.f32 %v5373_v13, %v2614_v15  ;;  %v3210_v19 = vpop.f32.mrf.mxu0  ;;  %v2205_v8 = vadd.f32 %v2117_v32, %v4865_v40 }
 0x2aa   : > { %3977 = vmatmul.msk.bf16.gmra.mxu3 %vm533_vm2, %v2812_v12  ;;  %v2816_v15 = vrot.slane %v2814_v48, 2  ;;  %v2819_v32 = vrot.slane %v2817_v56, 3  ;;  %v2415_v12 = vrot.slane %v5407_v10, 2 }
 0x2ab   : > { %v3297_v20 = vadd.f32 %v3208_v27, %v3029_v9  ;;  %v2004_v27 = vsel %vm1973_vm6, %v2001_v34, %v2003_v54 }
 0x2ad   : > { %v3342_v37 = vadd.f32 %v5297_v16, %v3297_v20  ;;  %v5457_v40 = vpop.f32.mrf.mxu3 }
 0x2ae   : > { %v2527_v35 = vpop.f32.mrf.mxu2 }
 0x2af   : > { %v3383_v13 = vmax.f32 %v3342_v37, 0.0  ;;  %v2615_v60 = vadd.f32 %v2527_v35, %v2205_v8 }
 0x2b0   : > { %v2120_v39 = vpop.f32.mrf.mxu1 }
 0x2b1   : > { %3424 = vst [vmem:[%s5312_s9 + $0x50] sm:$0xff] %v3383_v13  ;;  %v3030_v21 = vadd.f32 %v5387_v5, %v2615_v60  ;;  %v3213_v28 = vpop.f32.mrf.mxu0  ;;  %v2206_v5 = vadd.f32 %v2120_v39, %v4878_v61  ;;  %v4157_v61 = vld [vmem:[%s4340_s11 + $0x88] sm:$0xff]  ;;  %v3098_v13 = vrot.slane %v5407_v10, 3 }
 0x2b2   : > { %v2005_v43 = vrot.slane %v4157_v61, 2 }
 0x2b3   : > { %v3298_v25 = vadd.f32 %v3210_v19, %v3030_v21  ;;  %3855 = vmatmul.msk.bf16.gmra.mxu1 %vm533_vm2, %v2004_v27  ;;  %3953 = vmatmul.msk.bf16.gmra.mxu2 %vm533_vm2, %v2414_v51  ;;  %v2820_v19 = vor.u32 %v2819_v32, %v2816_v15  ;;  %v2416_v21 = vsel %vm1973_vm6, %v2413_v29, %v2415_v12 }
 0x2b4   : > { %3997 = vmatmul.msk.bf16.gmra.mxu0 %vm533_vm2, %v3097_v50  ;;  %v2006_v51 = vsel %vm1973_vm6, %v2003_v54, %v2005_v43  ;;  %v3099_v50 = vsel %vm3066_vm7, %v3096_v42, %v3098_v13 }
 0x2b5   : > { %v3343_v34 = vadd.f32 %v5297_v16, %v3298_v25  ;;  %v5471_v9 = vpop.f32.mrf.mxu3  ;;  %v2821_v37 = vsel %vm2651_vm5, %v2811_v17, %v2820_v19  ;;  %v5491_v25 = vld [vmem:[%s4340_s11 + $0xa8] sm:$0xff] }
 0x2b6   : > { %v2530_v38 = vpop.f32.mrf.mxu2  ;;  %v2823_v42 = vshrl.u32 %v5491_v25, 16 }
 0x2b7   : > { %v3384_v44 = vmax.f32 %v3343_v34, 0.0  ;;  %v2616_v36 = vadd.f32 %v2530_v38, %v2206_v5  ;;  %v2826_v34 = vshll.u32 %v5491_v25, 16 }
 0x2b8   : > { %v2122_v31 = vpop.f32.mrf.mxu1  ;;  %v2825_v56 = vrot.slane %v2823_v42, 2 }
 0x2b9   : > { %3425 = vst [vmem:[%s5312_s9 + $0x58] sm:$0xff] %v3384_v44  ;;  %v3031_v24 = vadd.f32 %v5401_v11, %v2616_v36  ;;  %v3215_v1 = vpop.f32.mrf.mxu0  ;;  %v2207_v35 = vadd.f32 %v2122_v31, %v4892_v7  ;;  %v2828_v44 = vrot.slane %v2826_v34, 3 }
 0x2ba   : > { %3978 = vmatmul.msk.bf16.gmra.mxu3 %vm533_vm2, %v2821_v37 }
 0x2bb   : > { %v3299_v20 = vadd.f32 %v3213_v28, %v3031_v24  ;;  %v2829_v32 = vor.u32 %v2828_v44, %v2825_v56 }
 0x2bd   : > { %v3344_v8 = vadd.f32 %v5297_v16, %v3299_v20  ;;  %v5485_v7 = vpop.f32.mrf.mxu3  ;;  %v2417_v20 = vrot.slane %v5435_v3, 2  ;;  %v2830_v61 = vsel %vm2651_vm5, %v2820_v19, %v2829_v32 }
 0x2be   : > { %v2532_v60 = vpop.f32.mrf.mxu2 }
 0x2bf   : > { %v3385_v11 = vmax.f32 %v3344_v8, 0.0  ;;  %v2617_v39 = vadd.f32 %v2532_v60, %v2207_v35 }
 0x2c0   : > { %v2125_v27 = vpop.f32.mrf.mxu1 }
 0x2c1   : > { %3426 = vst [vmem:[%s5312_s9 + $0x60] sm:$0xff] %v3385_v11  ;;  %v3032_v17 = vadd.f32 %v5415_v6, %v2617_v39  ;;  %v3218_v28 = vpop.f32.mrf.mxu0  ;;  %v2208_v6 = vadd.f32 %v2125_v27, %v4905_v26  ;;  %v4158_v26 = vld [vmem:[%s4340_s11 + $0x90] sm:$0xff] }
 0x2c3   : > { %v3300_v10 = vadd.f32 %v3215_v1, %v3032_v17  ;;  %3856 = vmatmul.msk.bf16.gmra.mxu1 %vm533_vm2, %v2006_v51  ;;  %3954 = vmatmul.msk.bf16.gmra.mxu2 %vm533_vm2, %v2416_v21  ;;  %v2007_v1 = vrot.slane %v4158_v26, 2  ;;  %v2418_v51 = vsel %vm1973_vm6, %v2415_v12, %v2417_v20 }
 0x2c4   : > { %3998 = vmatmul.msk.bf16.gmra.mxu0 %vm533_vm2, %v3099_v50 }
 0x2c5   : > { %v3345_v54 = vadd.f32 %v5297_v16, %v3300_v10  ;;  %v5499_v15 = vpop.f32.mrf.mxu3  ;;  %v2008_v27 = vsel %vm1973_vm6, %v2005_v43, %v2007_v1 }
 0x2c6   : > { %v2535_v29 = vpop.f32.mrf.mxu2 }
 0x2c7   : > { %v3386_v5 = vmax.f32 %v3345_v54, 0.0  ;;  %v2618_v38 = vadd.f32 %v2535_v29, %v2208_v6 }
 0x2c8   : > { %v2127_v48 = vpop.f32.mrf.mxu1 }
 0x2c9   : > { %3427 = vst [vmem:[%s5312_s9 + $0x68] sm:$0xff] %v3386_v5  ;;  %v3033_v36 = vadd.f32 %v5429_v45, %v2618_v38  ;;  %v3220_v31 = vpop.f32.mrf.mxu0  ;;  %v2209_v8 = vadd.f32 %v2127_v48, %v4919_v33  ;;  %v3100_v45 = vrot.slane %v5435_v3, 3  ;;  %v5516_v33 = vld [vmem:[%s4340_s11 + $0xb0] sm:$0xf]  ;;  %v2645_v3 = vld [vmem:[%s4340_s11 + $0xb4] sm:$0x7] }
 0x2ca   : > { %3979 = vmatmul.msk.bf16.gmra.mxu3 %vm533_vm2, %v2830_v61  ;;  %v2361_v50 = vunpack.c.l.b16 %v5516_v33  ;;  %v2649_v43 = vunpack.c.l.b16 %v2645_v3  ;;  %v2419_v61 = vrot.slane %v5463_v53, 2 }
 0x2cb   : > { %v3301_v24 = vadd.f32 %v3218_v28, %v3033_v36  ;;  %v3101_v17 = vsel %vm3066_vm7, %v3098_v13, %v3100_v45 }
 0x2cc   : > { %v5527_v13 = vpack.c.b16 %v2649_v43, %v2361_v50 }
 0x2cd   : > { %v3346_v37 = vadd.f32 %v5297_v16, %v3301_v24  ;;  %v5513_v28 = vpop.f32.mrf.mxu3  ;;  %v4159_v24 = vld [vmem:[%s4340_s11 + $0x98] sm:$0xff] }
 0x2ce   : > { %v2537_v35 = vpop.f32.mrf.mxu2  ;;  %v2832_v42 = vshrl.u32 %v5527_v13, 16  ;;  %v2835_v34 = vshll.u32 %v5527_v13, 16  ;;  %v2009_v26 = vrot.slane %v4159_v24, 2 }
 0x2cf   : > { %v3387_v60 = vmax.f32 %v3346_v37, 0.0  ;;  %v2619_v11 = vadd.f32 %v2537_v35, %v2209_v8  ;;  %v3102_v35 = vrot.slane %v5463_v53, 3 }
 0x2d0   : > { %v2130_v39 = vpop.f32.mrf.mxu1  ;;  %v2837_v44 = vrot.slane %v2835_v34, 3 }
 0x2d1   : > { %3428 = vst [vmem:[%s5312_s9 + $0x70] sm:$0xff] %v3387_v60  ;;  %v3034_v19 = vadd.f32 %v5443_v62, %v2619_v11  ;;  %v3223_v21 = vpop.f32.mrf.mxu0  ;;  %v2210_v12 = vadd.f32 %v2130_v39, %v4930_v52  ;;  %v2834_v52 = vrot.slane %v2832_v42, 2  ;;  %v2421_v42 = vrot.slane %v5491_v25, 2 }
 0x2d3   : > { %v3302_v10 = vadd.f32 %v3220_v31, %v3034_v19  ;;  %3857 = vmatmul.msk.bf16.gmra.mxu1 %vm533_vm2, %v2008_v27  ;;  %3955 = vmatmul.msk.bf16.gmra.mxu2 %vm533_vm2, %v2418_v51  ;;  %v2838_v31 = vor.u32 %v2837_v44, %v2834_v52  ;;  %v2010_v51 = vsel %vm1973_vm6, %v2007_v1, %v2009_v26 }
 0x2d4   : > { %3999 = vmatmul.msk.bf16.gmra.mxu0 %vm533_vm2, %v3101_v17  ;;  %v2420_v19 = vsel %vm1973_vm6, %v2417_v20, %v2419_v61 }
 0x2d5   : > { %v3347_v62 = vadd.f32 %v5297_v16, %v3302_v10  ;;  %v5533_v56 = vpop.f32.mrf.mxu3 }
 0x2d6   : > { %v2540_v54 = vpop.f32.mrf.mxu2 }
 0x2d7   : > { %v3388_v6 = vmax.f32 %v3347_v62, 0.0  ;;  %v2620_v29 = vadd.f32 %v2540_v54, %v2210_v12 }
 0x2d8   : > { %v2132_v5 = vpop.f32.mrf.mxu1 }
 0x2d9   : > { %3429 = vst [vmem:[%s5312_s9 + $0x78] sm:$0xff] %v3388_v6  ;;  %v3035_v38 = vadd.f32 %v5457_v40, %v2620_v29  ;;  %v3225_v48 = vpop.f32.mrf.mxu0  ;;  %v2211_v8 = vadd.f32 %v2132_v5, %v4944_v59  ;;  %v2839_v40 = vsel %vm2651_vm5, %v2829_v32, %v2838_v31  ;;  %v3103_v59 = vsel %vm3066_vm7, %v3100_v45, %v3102_v35  ;;  %v4160_v6 = vld [vmem:[%s4340_s11 + $0xa0] sm:$0xff] }
 0x2da   : > { %3980 = vmatmul.msk.bf16.gmra.mxu3 %vm533_vm2, %v2839_v40  ;;  %v2011_v29 = vrot.slane %v4160_v6, 2  ;;  %v3104_v5 = vrot.slane %v5491_v25, 3 }
 0x2db   : > { %v3303_v36 = vadd.f32 %v3223_v21, %v3035_v38 }
 0x2dc   : > { %v2012_v44 = vsel %vm1973_vm6, %v2009_v26, %v2011_v29 }
 0x2dd   : > { %v3348_v37 = vadd.f32 %v5297_v16, %v3303_v36  ;;  %v5547_v53 = vpop.f32.mrf.mxu3  ;;  %v2422_v36 = vsel %vm1973_vm6, %v2419_v61, %v2421_v42 }
 0x2de   : > { %v2542_v60 = vpop.f32.mrf.mxu2 }
 0x2df   : > { %v3389_v11 = vmax.f32 %v3348_v37, 0.0  ;;  %v2621_v39 = vadd.f32 %v2542_v60, %v2211_v8  ;;  %v3105_v8 = vsel %vm3066_vm7, %v3102_v35, %v3104_v5 }
 0x2e0   : > { %v2135_v27 = vpop.f32.mrf.mxu1 }
 0x2e1   : > { %3430 = vst [vmem:[%s5312_s9 + $0x80] sm:$0xff] %v3389_v11  ;;  %v3036_v21 = vadd.f32 %v5471_v9, %v2621_v39  ;;  %v3228_v17 = vpop.f32.mrf.mxu0  ;;  %v2212_v20 = vadd.f32 %v2135_v27, %v4954_v41 }
 0x2e3   : > { %v3304_v32 = vadd.f32 %v3225_v48, %v3036_v21  ;;  %3858 = vmatmul.msk.bf16.gmra.mxu1 %vm533_vm2, %v2010_v51  ;;  %3956 = vmatmul.msk.bf16.gmra.mxu2 %vm533_vm2, %v2420_v19 }
 0x2e4   : > { %4000 = vmatmul.msk.bf16.gmra.mxu0 %vm533_vm2, %v3103_v59 }
 0x2e5   : > { %v3349_v1 = vadd.f32 %v5297_v16, %v3304_v32  ;;  %v5556_v12 = vpop.f32.mrf.mxu3 }
 0x2e6   : > { %v2545_v3 = vpop.f32.mrf.mxu2 }
 0x2e7   : > { %v3390_v10 = vmax.f32 %v3349_v1, 0.0  ;;  %v2622_v9 = vadd.f32 %v2545_v3, %v2212_v20  ;;  %v3106_v1 = vrot.slane %v5527_v13, 3 }
 0x2e8   : > { %v2137_v43 = vpop.f32.mrf.mxu1 }
 0x2e9   : > { %3431 = vst [vmem:[%s5312_s9 + $0x88] sm:$0xff] %v3390_v10  ;;  %v3037_v45 = vadd.f32 %v5485_v7, %v2622_v9  ;;  %v3230_v62 = vpop.f32.mrf.mxu0  ;;  %v2213_v41 = vadd.f32 %v2137_v43, %v4973_v0  ;;  %v2276_v0 = vld [vmem:[%s4340_s11 + $0xb4] sm:$0x3]  ;;  %v3107_v43 = vsel %vm3066_vm7, %v3104_v5, %v3106_v1 }
 0x2ea   : > { %3981 = vmatmul.msk.bf16.gmra.mxu3 %vm533_vm2, %v2838_v31  ;;  %v2362_v31 = vunpack.c.l.b16 %v2276_v0 }
 0x2eb   : > { %v3305_v54 = vadd.f32 %v3228_v17, %v3037_v45  ;;  %v2013_v17 = vrot.slane %v4962_v2, 2 }
 0x2ec   : > { %v2383_v35 = vpack.c.b16 %v2362_v31, %v2361_v50 }
 0x2ed   : > { %v3350_v34 = vadd.f32 %v5297_v16, %v3305_v54  ;;  %v5570_v40 = vpop.f32.mrf.mxu3  ;;  %v2014_v10 = vsel %vm1973_vm6, %v2011_v29, %v2013_v17 }
 0x2ee   : > { %v2547_v38 = vpop.f32.mrf.mxu2  ;;  %v2423_v59 = vrot.slane %v2383_v35, 2 }
 0x2ef   : > { %v3391_v7 = vmax.f32 %v3350_v34, 0.0  ;;  %v2623_v48 = vadd.f32 %v2547_v38, %v2213_v41 }
 0x2f0   : > { %v2140_v52 = vpop.f32.mrf.mxu1 }
 0x2f1   : > { %3432 = vst [vmem:[%s5312_s9 + $0x90] sm:$0xff] %v3391_v7  ;;  %v3038_v24 = vadd.f32 %v5499_v15, %v2623_v48  ;;  %v3233_v37 = vpop.f32.mrf.mxu0  ;;  %v2214_v61 = vadd.f32 %v2140_v52, %v4993_v22 }
 0x2f3   : > { %v3306_v25 = vadd.f32 %v3230_v62, %v3038_v24  ;;  %3859 = vmatmul.msk.bf16.gmra.mxu1 %vm533_vm2, %v2012_v44  ;;  %3957 = vmatmul.msk.bf16.gmra.mxu2 %vm533_vm2, %v2422_v36 }
 0x2f4   : > { %4001 = vmatmul.msk.bf16.gmra.mxu0 %vm533_vm2, %v3105_v8 }
 0x2f5   : > { %v3351_v26 = vadd.f32 %v5297_v16, %v3306_v25  ;;  %v5581_v19 = vpop.f32.mrf.mxu3 }
 0x2f6   : > { %v2550_v15 = vpop.f32.mrf.mxu2 }
 0x2f7   : > { %v3392_v60 = vmax.f32 %v3351_v26, 0.0  ;;  %v2624_v11 = vadd.f32 %v2550_v15, %v2214_v61 }
 0x2f8   : > { %v2142_v39 = vpop.f32.mrf.mxu1 }
 0x2f9   : > { %3433 = vst [vmem:[%s5312_s9 + $0x98] sm:$0xff] %v3392_v60  ;;  %v3039_v27 = vadd.f32 %v5513_v28, %v2624_v11  ;;  %v3235_v51 = vpop.f32.mrf.mxu0  ;;  %v2215_v32 = vadd.f32 %v2142_v39, %v5006_v14  ;;  %v2424_v28 = vsel %vm1973_vm6, %v2421_v42, %v2423_v59 }
 0x2fb   : > { %v3307_v21 = vadd.f32 %v3233_v37, %v3039_v27 }
 0x2fd   : > { %v3352_v22 = vadd.f32 %v5297_v16, %v3307_v21  ;;  %v2980_v45 = vpop.f32.mrf.mxu3 }
 0x2fe   : > { %v2552_v20 = vpop.f32.mrf.mxu2 }
 0x2ff   : > { %v3393_v33 = vmax.f32 %v3352_v22, 0.0  ;;  %v2625_v50 = vadd.f32 %v2552_v20, %v2215_v32 }
 0x300   : > { %v2145_v3 = vpop.f32.mrf.mxu1 }
 0x301   : > { %3434 = vst [vmem:[%s5312_s9 + $0xa0] sm:$0xff] %v3393_v33  ;;  %v3040_v9 = vadd.f32 %v5533_v56, %v2625_v50  ;;  %v3238_v2 = vpop.f32.mrf.mxu0  ;;  %v2216_v13 = vadd.f32 %v2145_v3, %v5018_v23 }
 0x303   : > { %v3308_v62 = vadd.f32 %v3235_v51, %v3040_v9  ;;  %3860 = vmatmul.msk.bf16.gmra.mxu1 %vm533_vm2, %v2014_v10  ;;  %3958 = vmatmul.msk.bf16.gmra.mxu2 %vm533_vm2, %v2424_v28 }
 0x304   : > { %4002 = vmatmul.msk.bf16.gmra.mxu0 %vm533_vm2, %v3107_v43 }
 0x305   : > { %v3353_v14 = vadd.f32 %v5297_v16, %v3308_v62  ;;  %v2982_v41 = vpop.f32.mrf.mxu3 }
 0x306   : > { %v2555_v54 = vpop.f32.mrf.mxu2 }
 0x307   : > { %v3394_v6 = vmax.f32 %v3353_v14, 0.0  ;;  %v2626_v29 = vadd.f32 %v2555_v54, %v2216_v13 }
 0x308   : > { %v2147_v56 = vpop.f32.mrf.mxu1 }
 0x309   : > { %3435 = vst [vmem:[%s5312_s9 + $0xa8] sm:$0xff] %v3394_v6  ;;  %v3041_v42 = vadd.f32 %v5547_v53, %v2626_v29  ;;  %v3240_v34 = vpop.f32.mrf.mxu0  ;;  %v2217_v7 = vadd.f32 %v2147_v56, %v5032_v57 }
 0x30b   : > { %v3309_v5 = vadd.f32 %v3238_v2, %v3041_v42 }
 0x30d   : > { %v3354_v38 = vadd.f32 %v5297_v16, %v3309_v5  ;;  %v2985_v37 = vpop.f32.mrf.mxu3 }
 0x30e   : > { %v2557_v48 = vpop.f32.mrf.mxu2 }
 0x30f   : > { %v3395_v52 = vmax.f32 %v3354_v38, 0.0  ;;  %v2627_v44 = vadd.f32 %v2557_v48, %v2217_v7 }
 0x310   : > { %v2150_v23 = vpop.f32.mrf.mxu1 }
 0x311   : > { %3436 = vst [vmem:[%s5312_s9 + $0xb0] sm:$0xff] %v3395_v52  ;;  %v3042_v36 = vadd.f32 %v5556_v12, %v2627_v44  ;;  %v3243_v24 = vpop.f32.mrf.mxu0  ;;  %v2218_v57 = vadd.f32 %v2150_v23, %v5048_v18 }
 0x313   : > { %v3310_v8 = vadd.f32 %v3240_v34, %v3042_v36  ;;  %3861 = vmatmul.msk.bf16.gmra.mxu1 %vm533_vm2, %v2013_v17  ;;  %3959 = vmatmul.msk.bf16.gmra.mxu2 %vm533_vm2, %v2423_v59 }
 0x314   : > { %4003 = vmatmul.msk.bf16.gmra.mxu0 %vm533_vm2, %v3106_v1 }
 0x315   : > { %v3355_v53 = vadd.f32 %v5297_v16, %v3310_v8  ;;  %v2987_v15 = vpop.f32.mrf.mxu3 }
 0x316   : > { %v2560_v0 = vpop.f32.mrf.mxu2 }
 0x317   : > { %v3396_v25 = vmax.f32 %v3355_v53, 0.0  ;;  %v2628_v31 = vadd.f32 %v2560_v0, %v2218_v57 }
 0x318   : > { %v2152_v26 = vpop.f32.mrf.mxu1 }
 0x319   : > { %3437 = vst [vmem:[%s5312_s9 + $0xb8] sm:$0xff] %v3396_v25  ;;  %v3043_v12 = vadd.f32 %v5570_v40, %v2628_v31  ;;  %v3245_v61 = vpop.f32.mrf.mxu0  ;;  %v2219_v39 = vadd.f32 %v2152_v26, %v5065_v58 }
 0x31b   : > { %v3311_v60 = vadd.f32 %v3243_v24, %v3043_v12 }
 0x31d   : > { %v3356_v11 = vadd.f32 %v5297_v16, %v3311_v60  ;;  %v2990_v59 = vpop.f32.mrf.mxu3 }
 0x31e   : > { %v2562_v35 = vpop.f32.mrf.mxu2 }
 0x31f   : > { %v3397_v27 = vmax.f32 %v3356_v11, 0.0  ;;  %v2629_v51 = vadd.f32 %v2562_v35, %v2219_v39 }
 0x320   : > { %v2155_v18 = vpop.f32.mrf.mxu1 }
 0x321   : > { %3438 = vst [vmem:[%s5312_s9 + $0xc0] sm:$0xff] %v3397_v27  ;;  %v3044_v21 = vadd.f32 %v5581_v19, %v2629_v51  ;;  %v3248_v17 = vpop.f32.mrf.mxu0  ;;  %v2220_v32 = vadd.f32 %v2155_v18, %v5077_v46 }
 0x323   : > { %v3312_v22 = vadd.f32 %v3245_v61, %v3044_v21 }
 0x325   : > { %v3357_v40 = vadd.f32 %v5297_v16, %v3312_v22  ;;  %v2992_v10 = vpop.f32.mrf.mxu3 }
 0x326   : > { %v2565_v1 = vpop.f32.mrf.mxu2 }
 0x327   : > { %v3398_v20 = vmax.f32 %v3357_v40, 0.0  ;;  %v2630_v33 = vadd.f32 %v2565_v1, %v2220_v32  ;;  %v5754_v32 = vld [vmem:[#allocation7_spill] sm:$0xff] }
 0x328   : > { %v2157_v58 = vpop.f32.mrf.mxu1 }
 0x329   : > { %3439 = vst [vmem:[%s5312_s9 + $0xc8] sm:$0xff] %v3398_v20  ;;  %v3045_v50 = vadd.f32 %v2980_v45, %v2630_v33  ;;  %v3250_v3 = vpop.f32.mrf.mxu0  ;;  %v2221_v19 = vadd.f32 %v2157_v58, %v5093_v47 }
 0x32b   : > { %v3313_v28 = vadd.f32 %v3248_v17, %v3045_v50 }
 0x32d   : > { %v3358_v9 = vadd.f32 %v5297_v16, %v3313_v28  ;;  %v2995_v54 = vpop.f32.mrf.mxu3 }
 0x32e   : > { %v2567_v2 = vpop.f32.mrf.mxu2 }
 0x32f   : > { %v3399_v43 = vmax.f32 %v3358_v9, 0.0  ;;  %v2631_v62 = vadd.f32 %v2567_v2, %v2221_v19 }
 0x330   : > { %v2160_v14 = vpop.f32.mrf.mxu1 }
 0x331   : > { %3440 = vst [vmem:[%s5312_s9 + $0xd0] sm:$0xff] %v3399_v43  ;;  %v3046_v46 = vadd.f32 %v2982_v41, %v2631_v62  ;;  %v3253_v13 = vpop.f32.mrf.mxu0  ;;  %v2222_v45 = vadd.f32 %v2160_v14, %v5105_v4 }
 0x333   : > { %v3314_v6 = vadd.f32 %v3250_v3, %v3046_v46 }
 0x335   : > { %v3359_v29 = vadd.f32 %v5297_v16, %v3314_v6  ;;  %v2997_v7 = vpop.f32.mrf.mxu3 }
 0x336   : > { %v2570_v56 = vpop.f32.mrf.mxu2 }
 0x337   : > { %v3400_v42 = vmax.f32 %v3359_v29, 0.0  ;;  %v2632_v34 = vadd.f32 %v2570_v56, %v2222_v45 }
 0x338   : > { %v2162_v5 = vpop.f32.mrf.mxu1 }
 0x339   : > { %3441 = vst [vmem:[%s5312_s9 + $0xd8] sm:$0xff] %v3400_v42  ;;  %v3047_v47 = vadd.f32 %v2985_v37, %v2632_v34  ;;  %v3255_v38 = vpop.f32.mrf.mxu0  ;;  %v2223_v41 = vadd.f32 %v2162_v5, %v5121_v49 }
 0x33b   : > { %v3315_v48 = vadd.f32 %v3253_v13, %v3047_v47 }
 0x33d   : > { %v3360_v52 = vadd.f32 %v5297_v16, %v3315_v48  ;;  %v3000_v53 = vpop.f32.mrf.mxu3 }
 0x33e   : > { %v2572_v44 = vpop.f32.mrf.mxu2 }
 0x33f   : > { %v3401_v23 = vmax.f32 %v3360_v52, 0.0  ;;  %v2633_v36 = vadd.f32 %v2572_v44, %v2223_v41 }
 0x340   : > { %v2165_v24 = vpop.f32.mrf.mxu1 }
 0x341   : > { %3442 = vst [vmem:[%s5312_s9 + $0xe0] sm:$0xff] %v3401_v23  ;;  %v3048_v4 = vadd.f32 %v2987_v15, %v2633_v36  ;;  %v3258_v8 = vpop.f32.mrf.mxu0  ;;  %v2224_v37 = vadd.f32 %v2165_v24, %v5133_v55  ;;  %v5632_v15 = vld [vmem:[%s5707_s2] ss:$0 sm:$0xff] }
 0x343   : > { %v3316_v57 = vadd.f32 %v3255_v38, %v3048_v4 }
 0x345   : > { %v3361_v0 = vadd.f32 %v5297_v16, %v3316_v57  ;;  %v3002_v60 = vpop.f32.mrf.mxu3  ;;  %v5753_v16 = vld [vmem:[#allocation5_spill] sm:$0xff] }
 0x346   : > { %v2575_v25 = vpop.f32.mrf.mxu2 }
 0x347   : > { %v3402_v31 = vmax.f32 %v3361_v0, 0.0  ;;  %v2634_v26 = vadd.f32 %v2575_v25, %v2224_v37 }
 0x348   : > { %v2167_v12 = vpop.f32.mrf.mxu1 }
 0x349   : > { %3443 = vst [vmem:[%s5312_s9 + $0xe8] sm:$0xff] %v3402_v31  ;;  %v3049_v49 = vadd.f32 %v2990_v59, %v2634_v26  ;;  %v3260_v61 = vpop.f32.mrf.mxu0  ;;  %v2225_v35 = vadd.f32 %v2167_v12, %v5753_v16 }
 0x34b   : > { %v3317_v11 = vadd.f32 %v3258_v8, %v3049_v49 }
 0x34d   : > { %v3362_v39 = vadd.f32 %v5632_v15, %v3317_v11  ;;  %v3005_v59 = vpop.f32.mrf.mxu3 }
 0x34e   : > { %v2577_v55 = vpop.f32.mrf.mxu2 }
 0x34f   : > { %v3403_v27 = vmax.f32 %v3362_v39, 0.0  ;;  %v2635_v51 = vadd.f32 %v2577_v55, %v2225_v35 }
 0x350   : > { %v2170_v18 = vpop.f32.mrf.mxu1 }
 0x351   : > { %3444 = vst [vmem:[%s5312_s9 + $0xf0] sm:$0xff] %v3403_v27  ;;  %v3050_v21 = vadd.f32 %v2992_v10, %v2635_v51  ;;  %v3263_v17 = vpop.f32.mrf.mxu0  ;;  %v2226_v1 = vadd.f32 %v2170_v18, %v5754_v32  ;;  %v5755_v10 = vld [vmem:[#allocation9_spill] sm:$0xff] }
 0x353   : > { %v3318_v22 = vadd.f32 %v3260_v61, %v3050_v21 }
 0x355   : > { %v3363_v40 = vadd.f32 %v5632_v15, %v3318_v22  ;;  %v3007_v9 = vpop.f32.mrf.mxu3 }
 0x356   : > { %v2580_v20 = vpop.f32.mrf.mxu2 }
 0x357   : > { %v3404_v33 = vmax.f32 %v3363_v40, 0.0  ;;  %v2636_v58 = vadd.f32 %v2580_v20, %v2226_v1 }
 0x358   : > { %v2172_v50 = vpop.f32.mrf.mxu1 }
 0x359   : > { %3445 = vst [vmem:[%s5312_s9 + $0xf8] sm:$0xff] %v3404_v33  ;;  %v3051_v3 = vadd.f32 %v2995_v54, %v2636_v58  ;;  %v3265_v28 = vpop.f32.mrf.mxu0  ;;  %v2227_v43 = vadd.f32 %v2172_v50, %v5755_v10  ;;  %v5756_v54 = vld [vmem:[#allocation11_spill] sm:$0xff] }
 0x35b   : > { %v3319_v19 = vadd.f32 %v3263_v17, %v3051_v3 }
 0x35d   : > { %v3364_v2 = vadd.f32 %v5632_v15, %v3319_v19  ;;  %v3010_v45 = vpop.f32.mrf.mxu3 }
 0x35e   : > { %v2582_v62 = vpop.f32.mrf.mxu2 }
 0x35f   : > { %v3405_v14 = vmax.f32 %v3364_v2, 0.0  ;;  %v2637_v46 = vadd.f32 %v2582_v62, %v2227_v43  ;;  %v5759_v43 = vld [vmem:[#allocation16_spill] sm:$0xff] }
 0x360   : > { %v2175_v13 = vpop.f32.mrf.mxu1 }
 0x361   : > { %3446 = vst [vmem:[%s5312_s9 + $0x100] sm:$0xff] %v3405_v14  ;;  %v3052_v6 = vadd.f32 %v2997_v7, %v2637_v46  ;;  %v3268_v29 = vpop.f32.mrf.mxu0  ;;  %v2228_v34 = vadd.f32 %v2175_v13, %v5756_v54  ;;  %v5757_v7 = vld [vmem:[#allocation13_spill] sm:$0xff] }
 0x363   : > { %v3320_v56 = vadd.f32 %v3265_v28, %v3052_v6 }
 0x365   : > { %v3365_v42 = vadd.f32 %v5632_v15, %v3320_v56  ;;  %v3012_v44 = vpop.f32.mrf.mxu3 }
 0x366   : > { %v2585_v5 = vpop.f32.mrf.mxu2 }
 0x367   : > { %v3406_v47 = vmax.f32 %v3365_v42, 0.0  ;;  %v2638_v38 = vadd.f32 %v2585_v5, %v2228_v34 }
 0x368   : > { %v2177_v48 = vpop.f32.mrf.mxu1 }
 0x369   : > { %3447 = vst [vmem:[%s5312_s9 + $0x108] sm:$0xff] %v3406_v47  ;;  %v3053_v52 = vadd.f32 %v3000_v53, %v2638_v38  ;;  %v3270_v41 = vpop.f32.mrf.mxu0  ;;  %v2229_v24 = vadd.f32 %v2177_v48, %v5757_v7 }
 0x36b   : > { %v3321_v23 = vadd.f32 %v3268_v29, %v3053_v52 }
 0x36d   : > { %v3366_v36 = vadd.f32 %v5632_v15, %v3321_v23  ;;  %v3015_v31 = vpop.f32.mrf.mxu3 }
 0x36e   : > { %v2587_v4 = vpop.f32.mrf.mxu2 }
 0x36f   : > { %v3407_v8 = vmax.f32 %v3366_v36, 0.0  ;;  %v2639_v57 = vadd.f32 %v2587_v4, %v2229_v24 }
 0x370   : > { %v2180_v0 = vpop.f32.mrf.mxu1 }
 0x371   : > { %3448 = vst [vmem:[%s5312_s9 + $0x110] sm:$0xff] %v3407_v8  ;;  %v3054_v37 = vadd.f32 %v3002_v60, %v2639_v57  ;;  %v3273_v25 = vpop.f32.mrf.mxu0  ;;  %v2230_v53 = vadd.f32 %v2180_v0, %v5215_v63  ;;  %v5758_v60 = vld [vmem:[#allocation15_spill] sm:$0xff] }
 0x373   : > { %v3322_v26 = vadd.f32 %v3270_v41, %v3054_v37 }
 0x375   : > { %v3367_v12 = vadd.f32 %v5632_v15, %v3322_v26  ;;  %v3017_v55 = vpop.f32.mrf.mxu3 }
 0x376   : > { %v2590_v49 = vpop.f32.mrf.mxu2 }
 0x377   : > { %v3408_v61 = vmax.f32 %v3367_v12, 0.0  ;;  %v2640_v11 = vadd.f32 %v2590_v49, %v2230_v53 }
 0x378   : > { %v2182_v39 = vpop.f32.mrf.mxu1 }
 0x379   : > { %3449 = vst [vmem:[%s5312_s9 + $0x118] sm:$0xff] %v3408_v61  ;;  %v3055_v16 = vadd.f32 %v3005_v59, %v2640_v11  ;;  %v3275_v35 = vpop.f32.mrf.mxu0  ;;  %v2231_v18 = vadd.f32 %v2182_v39, %v5758_v60 }
 0x37b   : > { %v3323_v27 = vadd.f32 %v3273_v25, %v3055_v16 }
 0x37d   : > { %v3368_v51 = vadd.f32 %v5632_v15, %v3323_v27 }
 0x37e   : > { %v2592_v21 = vpop.f32.mrf.mxu2 }
 0x37f   : > { %v3409_v17 = vmax.f32 %v3368_v51, 0.0  ;;  %v2641_v22 = vadd.f32 %v2592_v21, %v2231_v18 }
 0x380   : > { %v2185_v40 = vpop.f32.mrf.mxu1 }
 0x381   : > { %3450 = vst [vmem:[%s5312_s9 + $0x120] sm:$0xff] %v3409_v17  ;;  %v3056_v63 = vadd.f32 %v3007_v9, %v2641_v22  ;;  %v3278_v32 = vpop.f32.mrf.mxu0  ;;  %v2232_v59 = vadd.f32 %v2185_v40, %v5243_v30 }
 0x383   : > { %v3324_v1 = vadd.f32 %v3275_v35, %v3056_v63 }
 0x385   : > { %v3369_v20 = vadd.f32 %v5632_v15, %v3324_v1 }
 0x386   : > { %v2595_v33 = vpop.f32.mrf.mxu2 }
 0x387   : > { %v3410_v58 = vmax.f32 %v3369_v20, 0.0  ;;  %v2642_v50 = vadd.f32 %v2595_v33, %v2232_v59 }
 0x388   : > { %v2187_v3 = vpop.f32.mrf.mxu1 }
 0x389   : > { %3451 = vst [vmem:[%s5312_s9 + $0x128] sm:$0xff] %v3410_v58  ;;  %v3057_v28 = vadd.f32 %v3010_v45, %v2642_v50  ;;  %v3280_v19 = vpop.f32.mrf.mxu0  ;;  %v2233_v9 = vadd.f32 %v2187_v3, %v5759_v43  ;;  %v5760_v45 = vld [vmem:[#allocation17_spill] sm:$0xff] }
 0x38b   : > { %v3325_v2 = vadd.f32 %v3278_v32, %v3057_v28 }
 0x38d   : > { %v3370_v10 = vadd.f32 %v5632_v15, %v3325_v2 }
 0x38e   : > { %v2597_v62 = vpop.f32.mrf.mxu2 }
 0x38f   : > { %v3411_v14 = vmax.f32 %v3370_v10, 0.0  ;;  %v2643_v46 = vadd.f32 %v2597_v62, %v2233_v9 }
 0x390   : > { %v2190_v13 = vpop.f32.mrf.mxu1 }
 0x391   : > { %3452 = vst [vmem:[%s5312_s9 + $0x130] sm:$0xff] %v3411_v14  ;;  %v3058_v30 = vadd.f32 %v3012_v44, %v2643_v46  ;;  %v3283_v6 = vpop.f32.mrf.mxu0  ;;  %v2234_v42 = vadd.f32 %v2190_v13, %v5760_v45 }
 0x393   : > { %v3326_v29 = vadd.f32 %v3280_v19, %v3058_v30 }
 0x395   : > { %v3371_v56 = vadd.f32 %v5632_v15, %v3326_v29 }
 0x396   : > { %v2600_v54 = vpop.f32.mrf.mxu2 }
 0x397   : > { %v3412_v34 = vmax.f32 %v3371_v56, 0.0  ;;  %v2644_v5 = vadd.f32 %v2600_v54, %v2234_v42 }
 0x398   : > { %v2192_v47 = vpop.f32.mrf.mxu1 }
 0x399   : > { %3453 = vst [vmem:[%s5312_s9 + $0x138] sm:$0xff] %v3412_v34  ;;  %v3059_v38 = vadd.f32 %v3015_v31, %v2644_v5  ;;  %v3285_v48 = vpop.f32.mrf.mxu0 }
 0x39b   : > { %v3327_v52 = vadd.f32 %v3283_v6, %v3059_v38 }
 0x39d   : > { %v3372_v41 = vadd.f32 %v5632_v15, %v3327_v52 }
 0x39e   : > { %v2602_v44 = vpop.f32.mrf.mxu2 }
 0x39f   : > { %v3413_v23 = vmax.f32 %v3372_v41, 0.0 }
 0x3a1   : > { %3454 = vst [vmem:[%s5312_s9 + $0x140] sm:$0xff] %v3413_v23 }
 0x3a2   : > { %4189 = shalt.err (!%p4186_p5)
}
 0x3a3   : > { %s4242_s5 = smov 128   ;;  %s4243_s9 = smov 8  }
 0x3a4   : > { %4077 = dma.vmem_to_hbm [thread:$0]  (%p4304_p4), %s3470_s15, 5248, %s3472_s26, %s3456_s27, %s4242_s5, %s4242_s5, %s4243_s9  }
 0x3a5 PF: > { %p4083_p6 = scmp.ge.s32.totalorder %s4240_s17, 2  ;;  %s3486_s10 = sand.u32 1, %s4220_s12  }
 0x3a6   : > { %s3487_s11 = scalar_lea.sflag [#allocation3], %s3486_s10 }
 0x3a7   : > { %p4080_p7 = pnand %p4083_p6, %p4311_p8 }
 0x3a9   : > { %p4081_p9 = pneg %p4080_p7 }
 0x3ab   : > { %4215 = dma.done.wait (%p4081_p9), %s3487_s11, 5248  }
 0x3ac   : > { %4217 = vsyncadd (%p4081_p9), %s3487_s11, 4294962048  ;;  %s16_s17 = sadd.s32 1, %s4240_s17   ;;  %s5761_s12 = smov %s4224_s13 }
 0x3ad   : > { %p13_p10 = scmp.ge.s32.totalorder %s16_s17, 4   ;;  %s5762_s13 = smov %s4228_s14 }
 0x3ae   : > { %s5763_s14 = smov %s4317_s25  ;;  %s5764_s15 = smov %s4236_s16 }
 0x3af   : > { %s5765_s16 = smov %s5767_s20  ;;  %15 = sbr.rel (!%p13_p10) target bundleno = 4 (0x4), region = 81 }
 0x3b4   :  { %3493 = vsyncpa [#allocation3], 1 }
 0x3b5   :  { %3495 = vsyncpa [#allocation3 + $0x1], 1 }

</bundles_post_ra>
